<compile_context>
chip_gen: v7x
topology: tpu7x:2x2x1
jax: 0.10.0
libtpu: 0.0.40
codegen_flags: <defaults>
</compile_context>

<pallas_src>
import functools

import jax
import jax.numpy as jnp
import numpy as np
from jax import lax
from jax.experimental import pallas as pl
from jax.experimental.pallas import tpu as pltpu


def get_temperature(epoch):
    return 30.0 - 2.9 * epoch if epoch < 10 else 1.0


def _round_up(x, m):
    return (x + m - 1) // m * m


# ---------------- Pallas kernel ----------------

def dynconv_kernel(w_ref, x_hbm, o_ref, slab_ref, q_ref, sem,
                   *, t_tile, c_in, wp, k_unpad, margin):
    """Grouped 3x3x3 conv3d for one (sample, T-tile) as a single im2col GEMM.

    w_ref : (1, c_out_pad, kpad)   mixed dynamic weights, bias folded in column k_unpad
    x_hbm : (N, T+2, c_in, lpad)   padded x, whole array left in HBM (pl.ANY)
    o_ref : (1, t_tile, c_out_pad, lout)
    slab_ref : VMEM (t_tile+2, c_in, lpad)   halo'd input slab
    q_ref    : VMEM (kpad, lout)             in-VMEM im2col tile (rebuilt per T-plane)
    """
    b = pl.program_id(0)
    jt = pl.program_id(1)
    kpad, lout = q_ref.shape

    # Manual DMA of the halo'd slab of padded x for this (sample, T-tile).
    cp = pltpu.make_async_copy(
        x_hbm.at[b, pl.ds(jt * t_tile, t_tile + 2), :, :], slab_ref, sem.at[0])
    cp.start()

    # Initialize the K-padding rows while the DMA is in flight:
    # zeros everywhere, plus a constant "ones" row at k_unpad (the folded-bias row).
    # Re-done every grid step so it is safe under megacore sharding.
    q_ref[pl.ds(k_unpad, kpad - k_unpad), :] = jnp.zeros(
        (kpad - k_unpad, lout), jnp.float32)
    q_ref[pl.ds(k_unpad, 1), :] = jnp.ones((1, lout), jnp.float32)

    cp.wait()

    w_mat = w_ref[0]                                   # (c_out_pad, kpad)

    for t in range(t_tile):                            # static, small unrolled loop
        # Build the (K, lout) im2col tile: each of the 27 taps is a lane-shifted window
        # of one padded temporal plane (zero-padding semantics come from the host padding,
        # shifts never read outside the margins for valid output columns).
        for kt in range(3):
            for kh in range(3):
                for kw in range(3):
                    kidx = (kt * 3 + kh) * 3 + kw
                    delta = (kh - 1) * wp + (kw - 1)
                    q_ref[pl.ds(kidx * c_in, c_in), :] = slab_ref[
                        t + kt, :, pl.ds(margin + delta, lout)]
        # One big MXU matmul per temporal plane; dynamic bias comes from the ones row.
        o_ref[0, t] = jnp.dot(w_mat, q_ref[...],
                              preferred_element_type=jnp.float32)


# ---------------- routing head + weight mixing (tiny -> plain JAX glue) ----------------

def sqeeze_expand(std_x, params):
    dn = ("NCHW", "OIHW", "NCHW")
    h = lax.conv_general_dilated(std_x, params["conv1_w"], (1, 1), "VALID",
                                 dimension_numbers=dn)
    h = jax.nn.relu(h + params["conv1_b"][None, :, None, None])
    h = lax.conv_general_dilated(h, params["conv2_w"], (1, 1), "VALID",
                                 dimension_numbers=dn)
    h = jax.nn.relu(h + params["conv2_b"][None, :, None, None])
    h = jnp.max(h, axis=(2, 3))                         # AdaptiveMaxPool2d(1) + Squeeze
    return h @ params["fc_w"].T + params["fc_b"]        # Linear(32, num_weights)


def routing(std_x, params, epochs_num):
    logits = sqeeze_expand(std_x, params)
    tau = get_temperature(epochs_num)
    phi = jax.nn.softmax(logits / tau, axis=1)          # (N, num_weights)
    dw = jnp.einsum("bn,nocklm->bocklm", phi, params["weights"],
                    precision=lax.Precision.HIGHEST)    # (N, c_out, c_in, 3,3,3)
    db = jnp.einsum("bn,no->bo", phi, params["biases"],
                    precision=lax.Precision.HIGHEST)    # (N, c_out)
    return dw, db


# ---------------- wrapper ----------------

def std_dynamic_conv(x, std_x, params, epochs_num, *, t_tile=2):
    """x: (N, C_in, T, H, W) f32, std_x: (N, 1, Hs, Ws) f32 -> (N, C_out, T, H, W)."""
    n, c_in, T, H, W = x.shape
    _, c_out = params["biases"].shape
    assert T % t_tile == 0, "t_tile must divide T"

    hp, wp = H + 2, W + 2
    hpwp = hp * wp
    k = c_in * 27
    margin = 128
    assert wp + 1 <= margin, "W too large for the fixed 128-lane margin"
    lout = _round_up(hpwp, 128)                 # lane-dense output width (multiple of 128)
    lpad = margin + lout + margin               # stored plane width incl. shift margins
    kpad = _round_up(k + 1, 128)                # K padded to 128 (incl. the bias row)
    c_out_pad = _round_up(c_out, 8)

    # --- routing head + dynamic weight / bias mixing (tiny) ---
    dw, db = routing(std_x, params, epochs_num)

    # Weights as a GEMM lhs: K ordered (kt, kh, kw, c_in), zero-padded to kpad,
    # dynamic bias folded into column k (multiplied by the kernel's ones row).
    wcol = jnp.transpose(dw, (0, 1, 3, 4, 5, 2)).reshape(n, c_out, k)
    wcol = jnp.pad(wcol, ((0, 0), (0, c_out_pad - c_out), (0, kpad - k)))
    wcol = wcol.at[:, :c_out, k].set(db)

    # x: zero-pad (T,H,W) by 1, move C_in next to the plane, flatten the padded (Hp,Wp)
    # plane onto the lane axis with zero margins on both sides (only ~1.x blow-up, no im2col).
    x_pad = jnp.pad(x, ((0, 0), (0, 0), (1, 1), (1, 1), (1, 1)))
    x_pad = jnp.transpose(x_pad, (0, 2, 1, 3, 4)).reshape(n, T + 2, c_in, hpwp)
    x_lanes = jnp.pad(x_pad, ((0, 0), (0, 0), (0, 0), (margin, lpad - margin - hpwp)))

    kernel = functools.partial(dynconv_kernel, t_tile=t_tile, c_in=c_in,
                               wp=wp, k_unpad=k, margin=margin)

    y = pl.pallas_call(
        kernel,
        out_shape=jax.ShapeDtypeStruct((n, T, c_out_pad, lout), jnp.float32),
        grid=(n, T // t_tile),
        in_specs=[
            pl.BlockSpec((1, c_out_pad, kpad), lambda b, jt: (b, 0, 0)),
            pl.BlockSpec(memory_space=pl.ANY),          # raw HBM ref; slab DMA'd manually
        ],
        out_specs=pl.BlockSpec((1, t_tile, c_out_pad, lout),
                               lambda b, jt: (b, jt, 0, 0)),
        scratch_shapes=[
            pltpu.VMEM((t_tile + 2, c_in, lpad), jnp.float32),   # halo'd input slab
            pltpu.VMEM((kpad, lout), jnp.float32),               # in-VMEM im2col tile
            pltpu.SemaphoreType.DMA((1,)),
        ],
        compiler_params=pltpu.CompilerParams(
            dimension_semantics=("parallel", "parallel"),
            vmem_limit_bytes=48 * 1024 * 1024,
        ),
    )(wcol, x_lanes)

    # Drop padded channels / padded-plane border / lane padding, back to NCDHW.
    out = y[:, :, :c_out, :hpwp].reshape(n, T, c_out, hp, wp)[:, :, :, 1:1 + H, 1:1 + W]
    return jnp.transpose(out, (0, 2, 1, 3, 4))


# ---------------- pure-JAX reference (mirrors the PyTorch forward) ----------------

def reference(x, std_x, params, epochs_num):
    n, c_in, T, H, W = x.shape
    dw, db = routing(std_x, params, epochs_num)
    c_out = dw.shape[1]
    x_pad = jnp.pad(x, ((0, 0), (0, 0), (1, 1), (1, 1), (1, 1)))
    out = jnp.zeros((n, c_out, T, H, W), jnp.float32)
    for kt in range(3):
        for kh in range(3):
            for kw in range(3):
                out = out + jnp.einsum(
                    "boc,bcthw->bothw",
                    dw[:, :, :, kt, kh, kw],
                    x_pad[:, :, kt:kt + T, kh:kh + H, kw:kw + W],
                    precision=lax.Precision.HIGHEST)
    return out + db[:, :, None, None, None]


# ---------------- deterministic parameter init ----------------

def init_params(key, input_dim, dims, num_weights):
    ks = jax.random.split(key, 6)
    fan_in = input_dim * 27
    weights = jax.random.normal(ks[0], (num_weights, dims, input_dim, 3, 3, 3),
                                jnp.float32) * np.sqrt(2.0 / fan_in)
    biases = jax.random.normal(ks[1], (num_weights, dims), jnp.float32)
    conv1_w = jax.random.normal(ks[2], (16, 1, 5, 5), jnp.float32) * np.sqrt(2.0 / 25)
    conv1_b = jnp.zeros((16,), jnp.float32)
    conv2_w = jax.random.normal(ks[3], (32, 16, 5, 5), jnp.float32) * np.sqrt(2.0 / (16 * 25))
    conv2_b = jnp.zeros((32,), jnp.float32)
    fc_w = jax.random.normal(ks[4], (num_weights, 32), jnp.float32) * np.sqrt(1.0 / 32)
    fc_b = jax.random.normal(ks[5], (num_weights,), jnp.float32) * 0.01
    return dict(weights=weights, biases=biases,
                conv1_w=conv1_w, conv1_b=conv1_b,
                conv2_w=conv2_w, conv2_b=conv2_b,
                fc_w=fc_w, fc_b=fc_b)


if __name__ == "__main__":
    # small shapes: N=2, C_in(input_dim)=4, C_out(dims)=8, num_weights=4, T=4, H=W=8
    N, INPUT_DIM, DIMS, NUM_WEIGHTS = 2, 4, 8, 4
    T, H, W = 4, 8, 8
    STD_HW = 16
    EPOCH = 3

    key = jax.random.PRNGKey(0)
    kx, ks, kp = jax.random.split(key, 3)
    x = jax.random.normal(kx, (N, INPUT_DIM, T, H, W), jnp.float32)
    std_x = jax.random.normal(ks, (N, 1, STD_HW, STD_HW), jnp.float32)
    params = init_params(kp, INPUT_DIM, DIMS, NUM_WEIGHTS)

    out = jax.block_until_ready(std_dynamic_conv(x, std_x, params, EPOCH, t_tile=2))
    ref = jax.block_until_ready(reference(x, std_x, params, EPOCH))

    assert out.shape == (N, DIMS, T, H, W)
    assert np.allclose(np.asarray(out), np.asarray(ref), atol=1e-4, rtol=1e-4)

    print("KERNEL_OK")
</pallas_src>

<mosaic_0001>
module attributes {stable_mosaic.version = 11 : i64} {
  func.func @dynconv_kernel(%arg0: i32, %arg1: i32, %arg2: memref<1x8x128xf32, #tpu.memory_space<vmem>>, %arg3: memref<2x6x4x384xf32, #tpu.memory_space<any>>, %arg4: memref<1x2x8x128xf32, #tpu.memory_space<vmem>>, %arg5: memref<4x4x384xf32, #tpu.memory_space<vmem>>, %arg6: memref<128x128xf32, #tpu.memory_space<vmem>>, %arg7: memref<1x!tpu.dma_semaphore, #tpu.memory_space<semaphore_mem>>) attributes {dimension_semantics = [#tpu.dimension_semantics<parallel>, #tpu.dimension_semantics<parallel>], iteration_bounds = array<i64: 2, 2>, scalar_prefetch = 0 : i64, scratch_operands = 3 : i64, tpu.core_type = #tpu.core_type<tc>, window_params = [{transform_indices = @transform_0, window_bounds = array<i64: 1, 8, 128>}, {}, {transform_indices = @transform_2, window_bounds = array<i64: 1, 2, 8, 128>}]} {
    %c2_i32 = arith.constant 2 : i32
    %0 = arith.muli %arg1, %c2_i32 : i32
    %c0_i32 = arith.constant 0 : i32
    %c0_i32_0 = arith.constant 0 : i32
    %c0_i32_1 = arith.constant 0 : i32
    %1 = tpu.memref_slice %arg3[%arg0, %0, %c0_i32_0, %c0_i32_1] : memref<2x6x4x384xf32, #tpu.memory_space<any>> -> memref<1x4x4x384xf32, #tpu.memory_space<any>>
    %2 = tpu.memref_squeeze %1 : memref<1x4x4x384xf32, #tpu.memory_space<any>> -> memref<4x4x384xf32, #tpu.memory_space<any>>
    %3 = tpu.memref_slice %arg7[%c0_i32] : memref<1x!tpu.dma_semaphore, #tpu.memory_space<semaphore_mem>> -> memref<1x!tpu.dma_semaphore, #tpu.memory_space<semaphore_mem>>
    %4 = tpu.memref_squeeze %3 : memref<1x!tpu.dma_semaphore, #tpu.memory_space<semaphore_mem>> -> memref<!tpu.dma_semaphore, #tpu.memory_space<semaphore_mem>>
    tpu.enqueue_dma source(%2 : memref<4x4x384xf32, #tpu.memory_space<any>>) target(%arg5 : memref<4x4x384xf32, #tpu.memory_space<vmem>>) target_semaphore(%4 : memref<!tpu.dma_semaphore, #tpu.memory_space<semaphore_mem>>)
    %cst = arith.constant 0.000000e+00 : f32
    %5 = vector.broadcast %cst : f32 to vector<20x128xf32>
    %c108 = arith.constant 108 : index
    %c0 = arith.constant 0 : index
    %6 = vector.load %arg6[%c108, %c0] : memref<128x128xf32, #tpu.memory_space<vmem>>, vector<20x128xf32>
    tpu.vector_store %arg6[%c108, %c0], %5 {strides = array<i32>} : memref<128x128xf32, #tpu.memory_space<vmem>>, vector<20x128xf32>,
    %cst_2 = arith.constant 1.000000e+00 : f32
    %7 = vector.broadcast %cst_2 : f32 to vector<1x128xf32>
    %c108_3 = arith.constant 108 : index
    %c0_4 = arith.constant 0 : index
    %8 = vector.load %arg6[%c108_3, %c0_4] : memref<128x128xf32, #tpu.memory_space<vmem>>, vector<1x128xf32>
    tpu.vector_store %arg6[%c108_3, %c0_4], %7 {strides = array<i32>} : memref<128x128xf32, #tpu.memory_space<vmem>>, vector<1x128xf32>,
    %c0_i32_5 = arith.constant 0 : i32
    %c0_i32_6 = arith.constant 0 : i32
    %c0_i32_7 = arith.constant 0 : i32
    %9 = tpu.memref_slice %arg3[%arg0, %0, %c0_i32_6, %c0_i32_7] : memref<2x6x4x384xf32, #tpu.memory_space<any>> -> memref<1x4x4x384xf32, #tpu.memory_space<any>>
    %10 = tpu.memref_squeeze %9 : memref<1x4x4x384xf32, #tpu.memory_space<any>> -> memref<4x4x384xf32, #tpu.memory_space<any>>
    %11 = tpu.memref_slice %arg7[%c0_i32_5] : memref<1x!tpu.dma_semaphore, #tpu.memory_space<semaphore_mem>> -> memref<1x!tpu.dma_semaphore, #tpu.memory_space<semaphore_mem>>
    %12 = tpu.memref_squeeze %11 : memref<1x!tpu.dma_semaphore, #tpu.memory_space<semaphore_mem>> -> memref<!tpu.dma_semaphore, #tpu.memory_space<semaphore_mem>>
    tpu.wait_dma2 semaphore(%12 : memref<!tpu.dma_semaphore, #tpu.memory_space<semaphore_mem>>) src(%10 : memref<4x4x384xf32, #tpu.memory_space<any>>) dst(%arg5 : memref<4x4x384xf32, #tpu.memory_space<vmem>>)
    %c0_8 = arith.constant 0 : index
    %c0_9 = arith.constant 0 : index
    %c0_10 = arith.constant 0 : index
    %13 = vector.load %arg2[%c0_8, %c0_9, %c0_10] : memref<1x8x128xf32, #tpu.memory_space<vmem>>, vector<1x8x128xf32>
    %14 = vector.shape_cast %13 : vector<1x8x128xf32> to vector<8x128xf32>
    %c0_11 = arith.constant 0 : index
    %c0_12 = arith.constant 0 : index
    %c117 = arith.constant 117 : index
    %15 = vector.load %arg5[%c0_11, %c0_12, %c117] : memref<4x4x384xf32, #tpu.memory_space<vmem>>, vector<1x4x128xf32>
    %16 = vector.shape_cast %15 : vector<1x4x128xf32> to vector<4x128xf32>
    %c0_13 = arith.constant 0 : index
    %c0_14 = arith.constant 0 : index
    %17 = vector.load %arg6[%c0_13, %c0_14] : memref<128x128xf32, #tpu.memory_space<vmem>>, vector<4x128xf32>
    tpu.vector_store %arg6[%c0_13, %c0_14], %16 {strides = array<i32>} : memref<128x128xf32, #tpu.memory_space<vmem>>, vector<4x128xf32>,
    %c0_15 = arith.constant 0 : index
    %c0_16 = arith.constant 0 : index
    %c118 = arith.constant 118 : index
    %18 = vector.load %arg5[%c0_15, %c0_16, %c118] : memref<4x4x384xf32, #tpu.memory_space<vmem>>, vector<1x4x128xf32>
    %19 = vector.shape_cast %18 : vector<1x4x128xf32> to vector<4x128xf32>
    %c4 = arith.constant 4 : index
    %c0_17 = arith.constant 0 : index
    %20 = vector.load %arg6[%c4, %c0_17] : memref<128x128xf32, #tpu.memory_space<vmem>>, vector<4x128xf32>
    tpu.vector_store %arg6[%c4, %c0_17], %19 {strides = array<i32>} : memref<128x128xf32, #tpu.memory_space<vmem>>, vector<4x128xf32>,
    %c0_18 = arith.constant 0 : index
    %c0_19 = arith.constant 0 : index
    %c119 = arith.constant 119 : index
    %21 = vector.load %arg5[%c0_18, %c0_19, %c119] : memref<4x4x384xf32, #tpu.memory_space<vmem>>, vector<1x4x128xf32>
    %22 = vector.shape_cast %21 : vector<1x4x128xf32> to vector<4x128xf32>
    %c8 = arith.constant 8 : index
    %c0_20 = arith.constant 0 : index
    %23 = vector.load %arg6[%c8, %c0_20] : memref<128x128xf32, #tpu.memory_space<vmem>>, vector<4x128xf32>
    tpu.vector_store %arg6[%c8, %c0_20], %22 {strides = array<i32>} : memref<128x128xf32, #tpu.memory_space<vmem>>, vector<4x128xf32>,
    %c0_21 = arith.constant 0 : index
    %c0_22 = arith.constant 0 : index
    %c127 = arith.constant 127 : index
    %24 = vector.load %arg5[%c0_21, %c0_22, %c127] : memref<4x4x384xf32, #tpu.memory_space<vmem>>, vector<1x4x128xf32>
    %25 = vector.shape_cast %24 : vector<1x4x128xf32> to vector<4x128xf32>
    %c12 = arith.constant 12 : index
    %c0_23 = arith.constant 0 : index
    %26 = vector.load %arg6[%c12, %c0_23] : memref<128x128xf32, #tpu.memory_space<vmem>>, vector<4x128xf32>
    tpu.vector_store %arg6[%c12, %c0_23], %25 {strides = array<i32>} : memref<128x128xf32, #tpu.memory_space<vmem>>, vector<4x128xf32>,
    %c0_24 = arith.constant 0 : index
    %c0_25 = arith.constant 0 : index
    %c128 = arith.constant 128 : index
    %27 = vector.load %arg5[%c0_24, %c0_25, %c128] : memref<4x4x384xf32, #tpu.memory_space<vmem>>, vector<1x4x128xf32>
    %28 = vector.shape_cast %27 : vector<1x4x128xf32> to vector<4x128xf32>
    %c16 = arith.constant 16 : index
    %c0_26 = arith.constant 0 : index
    %29 = vector.load %arg6[%c16, %c0_26] : memref<128x128xf32, #tpu.memory_space<vmem>>, vector<4x128xf32>
    tpu.vector_store %arg6[%c16, %c0_26], %28 {strides = array<i32>} : memref<128x128xf32, #tpu.memory_space<vmem>>, vector<4x128xf32>,
    %c0_27 = arith.constant 0 : index
    %c0_28 = arith.constant 0 : index
    %c129 = arith.constant 129 : index
    %30 = vector.load %arg5[%c0_27, %c0_28, %c129] : memref<4x4x384xf32, #tpu.memory_space<vmem>>, vector<1x4x128xf32>
    %31 = vector.shape_cast %30 : vector<1x4x128xf32> to vector<4x128xf32>
    %c20 = arith.constant 20 : index
    %c0_29 = arith.constant 0 : index
    %32 = vector.load %arg6[%c20, %c0_29] : memref<128x128xf32, #tpu.memory_space<vmem>>, vector<4x128xf32>
    tpu.vector_store %arg6[%c20, %c0_29], %31 {strides = array<i32>} : memref<128x128xf32, #tpu.memory_space<vmem>>, vector<4x128xf32>,
    %c0_30 = arith.constant 0 : index
    %c0_31 = arith.constant 0 : index
    %c137 = arith.constant 137 : index
    %33 = vector.load %arg5[%c0_30, %c0_31, %c137] : memref<4x4x384xf32, #tpu.memory_space<vmem>>, vector<1x4x128xf32>
    %34 = vector.shape_cast %33 : vector<1x4x128xf32> to vector<4x128xf32>
    %c24 = arith.constant 24 : index
    %c0_32 = arith.constant 0 : index
    %35 = vector.load %arg6[%c24, %c0_32] : memref<128x128xf32, #tpu.memory_space<vmem>>, vector<4x128xf32>
    tpu.vector_store %arg6[%c24, %c0_32], %34 {strides = array<i32>} : memref<128x128xf32, #tpu.memory_space<vmem>>, vector<4x128xf32>,
    %c0_33 = arith.constant 0 : index
    %c0_34 = arith.constant 0 : index
    %c138 = arith.constant 138 : index
    %36 = vector.load %arg5[%c0_33, %c0_34, %c138] : memref<4x4x384xf32, #tpu.memory_space<vmem>>, vector<1x4x128xf32>
    %37 = vector.shape_cast %36 : vector<1x4x128xf32> to vector<4x128xf32>
    %c28 = arith.constant 28 : index
    %c0_35 = arith.constant 0 : index
    %38 = vector.load %arg6[%c28, %c0_35] : memref<128x128xf32, #tpu.memory_space<vmem>>, vector<4x128xf32>
    tpu.vector_store %arg6[%c28, %c0_35], %37 {strides = array<i32>} : memref<128x128xf32, #tpu.memory_space<vmem>>, vector<4x128xf32>,
    %c0_36 = arith.constant 0 : index
    %c0_37 = arith.constant 0 : index
    %c139 = arith.constant 139 : index
    %39 = vector.load %arg5[%c0_36, %c0_37, %c139] : memref<4x4x384xf32, #tpu.memory_space<vmem>>, vector<1x4x128xf32>
    %40 = vector.shape_cast %39 : vector<1x4x128xf32> to vector<4x128xf32>
    %c32 = arith.constant 32 : index
    %c0_38 = arith.constant 0 : index
    %41 = vector.load %arg6[%c32, %c0_38] : memref<128x128xf32, #tpu.memory_space<vmem>>, vector<4x128xf32>
    tpu.vector_store %arg6[%c32, %c0_38], %40 {strides = array<i32>} : memref<128x128xf32, #tpu.memory_space<vmem>>, vector<4x128xf32>,
    %c1 = arith.constant 1 : index
    %c0_39 = arith.constant 0 : index
    %c117_40 = arith.constant 117 : index
    %42 = vector.load %arg5[%c1, %c0_39, %c117_40] : memref<4x4x384xf32, #tpu.memory_space<vmem>>, vector<1x4x128xf32>
    %43 = vector.shape_cast %42 : vector<1x4x128xf32> to vector<4x128xf32>
    %c36 = arith.constant 36 : index
    %c0_41 = arith.constant 0 : index
    %44 = vector.load %arg6[%c36, %c0_41] : memref<128x128xf32, #tpu.memory_space<vmem>>, vector<4x128xf32>
    tpu.vector_store %arg6[%c36, %c0_41], %43 {strides = array<i32>} : memref<128x128xf32, #tpu.memory_space<vmem>>, vector<4x128xf32>,
    %c1_42 = arith.constant 1 : index
    %c0_43 = arith.constant 0 : index
    %c118_44 = arith.constant 118 : index
    %45 = vector.load %arg5[%c1_42, %c0_43, %c118_44] : memref<4x4x384xf32, #tpu.memory_space<vmem>>, vector<1x4x128xf32>
    %46 = vector.shape_cast %45 : vector<1x4x128xf32> to vector<4x128xf32>
    %c40 = arith.constant 40 : index
    %c0_45 = arith.constant 0 : index
    %47 = vector.load %arg6[%c40, %c0_45] : memref<128x128xf32, #tpu.memory_space<vmem>>, vector<4x128xf32>
    tpu.vector_store %arg6[%c40, %c0_45], %46 {strides = array<i32>} : memref<128x128xf32, #tpu.memory_space<vmem>>, vector<4x128xf32>,
    %c1_46 = arith.constant 1 : index
    %c0_47 = arith.constant 0 : index
    %c119_48 = arith.constant 119 : index
    %48 = vector.load %arg5[%c1_46, %c0_47, %c119_48] : memref<4x4x384xf32, #tpu.memory_space<vmem>>, vector<1x4x128xf32>
    %49 = vector.shape_cast %48 : vector<1x4x128xf32> to vector<4x128xf32>
    %c44 = arith.constant 44 : index
    %c0_49 = arith.constant 0 : index
    %50 = vector.load %arg6[%c44, %c0_49] : memref<128x128xf32, #tpu.memory_space<vmem>>, vector<4x128xf32>
    tpu.vector_store %arg6[%c44, %c0_49], %49 {strides = array<i32>} : memref<128x128xf32, #tpu.memory_space<vmem>>, vector<4x128xf32>,
    %c1_50 = arith.constant 1 : index
    %c0_51 = arith.constant 0 : index
    %c127_52 = arith.constant 127 : index
    %51 = vector.load %arg5[%c1_50, %c0_51, %c127_52] : memref<4x4x384xf32, #tpu.memory_space<vmem>>, vector<1x4x128xf32>
    %52 = vector.shape_cast %51 : vector<1x4x128xf32> to vector<4x128xf32>
    %c48 = arith.constant 48 : index
    %c0_53 = arith.constant 0 : index
    %53 = vector.load %arg6[%c48, %c0_53] : memref<128x128xf32, #tpu.memory_space<vmem>>, vector<4x128xf32>
    tpu.vector_store %arg6[%c48, %c0_53], %52 {strides = array<i32>} : memref<128x128xf32, #tpu.memory_space<vmem>>, vector<4x128xf32>,
    %c1_54 = arith.constant 1 : index
    %c0_55 = arith.constant 0 : index
    %c128_56 = arith.constant 128 : index
    %54 = vector.load %arg5[%c1_54, %c0_55, %c128_56] : memref<4x4x384xf32, #tpu.memory_space<vmem>>, vector<1x4x128xf32>
    %55 = vector.shape_cast %54 : vector<1x4x128xf32> to vector<4x128xf32>
    %c52 = arith.constant 52 : index
    %c0_57 = arith.constant 0 : index
    %56 = vector.load %arg6[%c52, %c0_57] : memref<128x128xf32, #tpu.memory_space<vmem>>, vector<4x128xf32>
    tpu.vector_store %arg6[%c52, %c0_57], %55 {strides = array<i32>} : memref<128x128xf32, #tpu.memory_space<vmem>>, vector<4x128xf32>,
    %c1_58 = arith.constant 1 : index
    %c0_59 = arith.constant 0 : index
    %c129_60 = arith.constant 129 : index
    %57 = vector.load %arg5[%c1_58, %c0_59, %c129_60] : memref<4x4x384xf32, #tpu.memory_space<vmem>>, vector<1x4x128xf32>
    %58 = vector.shape_cast %57 : vector<1x4x128xf32> to vector<4x128xf32>
    %c56 = arith.constant 56 : index
    %c0_61 = arith.constant 0 : index
    %59 = vector.load %arg6[%c56, %c0_61] : memref<128x128xf32, #tpu.memory_space<vmem>>, vector<4x128xf32>
    tpu.vector_store %arg6[%c56, %c0_61], %58 {strides = array<i32>} : memref<128x128xf32, #tpu.memory_space<vmem>>, vector<4x128xf32>,
    %c1_62 = arith.constant 1 : index
    %c0_63 = arith.constant 0 : index
    %c137_64 = arith.constant 137 : index
    %60 = vector.load %arg5[%c1_62, %c0_63, %c137_64] : memref<4x4x384xf32, #tpu.memory_space<vmem>>, vector<1x4x128xf32>
    %61 = vector.shape_cast %60 : vector<1x4x128xf32> to vector<4x128xf32>
    %c60 = arith.constant 60 : index
    %c0_65 = arith.constant 0 : index
    %62 = vector.load %arg6[%c60, %c0_65] : memref<128x128xf32, #tpu.memory_space<vmem>>, vector<4x128xf32>
    tpu.vector_store %arg6[%c60, %c0_65], %61 {strides = array<i32>} : memref<128x128xf32, #tpu.memory_space<vmem>>, vector<4x128xf32>,
    %c1_66 = arith.constant 1 : index
    %c0_67 = arith.constant 0 : index
    %c138_68 = arith.constant 138 : index
    %63 = vector.load %arg5[%c1_66, %c0_67, %c138_68] : memref<4x4x384xf32, #tpu.memory_space<vmem>>, vector<1x4x128xf32>
    %64 = vector.shape_cast %63 : vector<1x4x128xf32> to vector<4x128xf32>
    %c64 = arith.constant 64 : index
    %c0_69 = arith.constant 0 : index
    %65 = vector.load %arg6[%c64, %c0_69] : memref<128x128xf32, #tpu.memory_space<vmem>>, vector<4x128xf32>
    tpu.vector_store %arg6[%c64, %c0_69], %64 {strides = array<i32>} : memref<128x128xf32, #tpu.memory_space<vmem>>, vector<4x128xf32>,
    %c1_70 = arith.constant 1 : index
    %c0_71 = arith.constant 0 : index
    %c139_72 = arith.constant 139 : index
    %66 = vector.load %arg5[%c1_70, %c0_71, %c139_72] : memref<4x4x384xf32, #tpu.memory_space<vmem>>, vector<1x4x128xf32>
    %67 = vector.shape_cast %66 : vector<1x4x128xf32> to vector<4x128xf32>
    %c68 = arith.constant 68 : index
    %c0_73 = arith.constant 0 : index
    %68 = vector.load %arg6[%c68, %c0_73] : memref<128x128xf32, #tpu.memory_space<vmem>>, vector<4x128xf32>
    tpu.vector_store %arg6[%c68, %c0_73], %67 {strides = array<i32>} : memref<128x128xf32, #tpu.memory_space<vmem>>, vector<4x128xf32>,
    %c2 = arith.constant 2 : index
    %c0_74 = arith.constant 0 : index
    %c117_75 = arith.constant 117 : index
    %69 = vector.load %arg5[%c2, %c0_74, %c117_75] : memref<4x4x384xf32, #tpu.memory_space<vmem>>, vector<1x4x128xf32>
    %70 = vector.shape_cast %69 : vector<1x4x128xf32> to vector<4x128xf32>
    %c72 = arith.constant 72 : index
    %c0_76 = arith.constant 0 : index
    %71 = vector.load %arg6[%c72, %c0_76] : memref<128x128xf32, #tpu.memory_space<vmem>>, vector<4x128xf32>
    tpu.vector_store %arg6[%c72, %c0_76], %70 {strides = array<i32>} : memref<128x128xf32, #tpu.memory_space<vmem>>, vector<4x128xf32>,
    %c2_77 = arith.constant 2 : index
    %c0_78 = arith.constant 0 : index
    %c118_79 = arith.constant 118 : index
    %72 = vector.load %arg5[%c2_77, %c0_78, %c118_79] : memref<4x4x384xf32, #tpu.memory_space<vmem>>, vector<1x4x128xf32>
    %73 = vector.shape_cast %72 : vector<1x4x128xf32> to vector<4x128xf32>
    %c76 = arith.constant 76 : index
    %c0_80 = arith.constant 0 : index
    %74 = vector.load %arg6[%c76, %c0_80] : memref<128x128xf32, #tpu.memory_space<vmem>>, vector<4x128xf32>
    tpu.vector_store %arg6[%c76, %c0_80], %73 {strides = array<i32>} : memref<128x128xf32, #tpu.memory_space<vmem>>, vector<4x128xf32>,
    %c2_81 = arith.constant 2 : index
    %c0_82 = arith.constant 0 : index
    %c119_83 = arith.constant 119 : index
    %75 = vector.load %arg5[%c2_81, %c0_82, %c119_83] : memref<4x4x384xf32, #tpu.memory_space<vmem>>, vector<1x4x128xf32>
    %76 = vector.shape_cast %75 : vector<1x4x128xf32> to vector<4x128xf32>
    %c80 = arith.constant 80 : index
    %c0_84 = arith.constant 0 : index
    %77 = vector.load %arg6[%c80, %c0_84] : memref<128x128xf32, #tpu.memory_space<vmem>>, vector<4x128xf32>
    tpu.vector_store %arg6[%c80, %c0_84], %76 {strides = array<i32>} : memref<128x128xf32, #tpu.memory_space<vmem>>, vector<4x128xf32>,
    %c2_85 = arith.constant 2 : index
    %c0_86 = arith.constant 0 : index
    %c127_87 = arith.constant 127 : index
    %78 = vector.load %arg5[%c2_85, %c0_86, %c127_87] : memref<4x4x384xf32, #tpu.memory_space<vmem>>, vector<1x4x128xf32>
    %79 = vector.shape_cast %78 : vector<1x4x128xf32> to vector<4x128xf32>
    %c84 = arith.constant 84 : index
    %c0_88 = arith.constant 0 : index
    %80 = vector.load %arg6[%c84, %c0_88] : memref<128x128xf32, #tpu.memory_space<vmem>>, vector<4x128xf32>
    tpu.vector_store %arg6[%c84, %c0_88], %79 {strides = array<i32>} : memref<128x128xf32, #tpu.memory_space<vmem>>, vector<4x128xf32>,
    %c2_89 = arith.constant 2 : index
    %c0_90 = arith.constant 0 : index
    %c128_91 = arith.constant 128 : index
    %81 = vector.load %arg5[%c2_89, %c0_90, %c128_91] : memref<4x4x384xf32, #tpu.memory_space<vmem>>, vector<1x4x128xf32>
    %82 = vector.shape_cast %81 : vector<1x4x128xf32> to vector<4x128xf32>
    %c88 = arith.constant 88 : index
    %c0_92 = arith.constant 0 : index
    %83 = vector.load %arg6[%c88, %c0_92] : memref<128x128xf32, #tpu.memory_space<vmem>>, vector<4x128xf32>
    tpu.vector_store %arg6[%c88, %c0_92], %82 {strides = array<i32>} : memref<128x128xf32, #tpu.memory_space<vmem>>, vector<4x128xf32>,
    %c2_93 = arith.constant 2 : index
    %c0_94 = arith.constant 0 : index
    %c129_95 = arith.constant 129 : index
    %84 = vector.load %arg5[%c2_93, %c0_94, %c129_95] : memref<4x4x384xf32, #tpu.memory_space<vmem>>, vector<1x4x128xf32>
    %85 = vector.shape_cast %84 : vector<1x4x128xf32> to vector<4x128xf32>
    %c92 = arith.constant 92 : index
    %c0_96 = arith.constant 0 : index
    %86 = vector.load %arg6[%c92, %c0_96] : memref<128x128xf32, #tpu.memory_space<vmem>>, vector<4x128xf32>
    tpu.vector_store %arg6[%c92, %c0_96], %85 {strides = array<i32>} : memref<128x128xf32, #tpu.memory_space<vmem>>, vector<4x128xf32>,
    %c2_97 = arith.constant 2 : index
    %c0_98 = arith.constant 0 : index
    %c137_99 = arith.constant 137 : index
    %87 = vector.load %arg5[%c2_97, %c0_98, %c137_99] : memref<4x4x384xf32, #tpu.memory_space<vmem>>, vector<1x4x128xf32>
    %88 = vector.shape_cast %87 : vector<1x4x128xf32> to vector<4x128xf32>
    %c96 = arith.constant 96 : index
    %c0_100 = arith.constant 0 : index
    %89 = vector.load %arg6[%c96, %c0_100] : memref<128x128xf32, #tpu.memory_space<vmem>>, vector<4x128xf32>
    tpu.vector_store %arg6[%c96, %c0_100], %88 {strides = array<i32>} : memref<128x128xf32, #tpu.memory_space<vmem>>, vector<4x128xf32>,
    %c2_101 = arith.constant 2 : index
    %c0_102 = arith.constant 0 : index
    %c138_103 = arith.constant 138 : index
    %90 = vector.load %arg5[%c2_101, %c0_102, %c138_103] : memref<4x4x384xf32, #tpu.memory_space<vmem>>, vector<1x4x128xf32>
    %91 = vector.shape_cast %90 : vector<1x4x128xf32> to vector<4x128xf32>
    %c100 = arith.constant 100 : index
    %c0_104 = arith.constant 0 : index
    %92 = vector.load %arg6[%c100, %c0_104] : memref<128x128xf32, #tpu.memory_space<vmem>>, vector<4x128xf32>
    tpu.vector_store %arg6[%c100, %c0_104], %91 {strides = array<i32>} : memref<128x128xf32, #tpu.memory_space<vmem>>, vector<4x128xf32>,
    %c2_105 = arith.constant 2 : index
    %c0_106 = arith.constant 0 : index
    %c139_107 = arith.constant 139 : index
    %93 = vector.load %arg5[%c2_105, %c0_106, %c139_107] : memref<4x4x384xf32, #tpu.memory_space<vmem>>, vector<1x4x128xf32>
    %94 = vector.shape_cast %93 : vector<1x4x128xf32> to vector<4x128xf32>
    %c104 = arith.constant 104 : index
    %c0_108 = arith.constant 0 : index
    %95 = vector.load %arg6[%c104, %c0_108] : memref<128x128xf32, #tpu.memory_space<vmem>>, vector<4x128xf32>
    tpu.vector_store %arg6[%c104, %c0_108], %94 {strides = array<i32>} : memref<128x128xf32, #tpu.memory_space<vmem>>, vector<4x128xf32>,
    %c0_109 = arith.constant 0 : index
    %c0_110 = arith.constant 0 : index
    %96 = vector.load %arg6[%c0_109, %c0_110] : memref<128x128xf32, #tpu.memory_space<vmem>>, vector<128x128xf32>
    %cst_111 = arith.constant dense<0.000000e+00> : vector<8x128xf32>
    %97 = tpu.matmul %14, %96, %cst_111 {dimension_numbers = #tpu.dot_dimension_numbers<[1], [0], [0], [1], [0, 0, 1, 1], [], []>} : vector<8x128xf32>, vector<128x128xf32>, vector<8x128xf32> -> vector<8x128xf32>
    %c0_112 = arith.constant 0 : index
    %c0_113 = arith.constant 0 : index
    %c0_114 = arith.constant 0 : index
    %c0_115 = arith.constant 0 : index
    %98 = vector.load %arg4[%c0_112, %c0_113, %c0_114, %c0_115] : memref<1x2x8x128xf32, #tpu.memory_space<vmem>>, vector<1x1x8x128xf32>
    %99 = vector.shape_cast %98 : vector<1x1x8x128xf32> to vector<8x128xf32>
    %100 = vector.shape_cast %97 : vector<8x128xf32> to vector<1x1x8x128xf32>
    tpu.vector_store %arg4[%c0_112, %c0_113, %c0_114, %c0_115], %100 {strides = array<i32>} : memref<1x2x8x128xf32, #tpu.memory_space<vmem>>, vector<1x1x8x128xf32>,
    %c1_116 = arith.constant 1 : index
    %c0_117 = arith.constant 0 : index
    %c117_118 = arith.constant 117 : index
    %101 = vector.load %arg5[%c1_116, %c0_117, %c117_118] : memref<4x4x384xf32, #tpu.memory_space<vmem>>, vector<1x4x128xf32>
    %102 = vector.shape_cast %101 : vector<1x4x128xf32> to vector<4x128xf32>
    %c0_119 = arith.constant 0 : index
    %c0_120 = arith.constant 0 : index
    %103 = vector.load %arg6[%c0_119, %c0_120] : memref<128x128xf32, #tpu.memory_space<vmem>>, vector<4x128xf32>
    tpu.vector_store %arg6[%c0_119, %c0_120], %102 {strides = array<i32>} : memref<128x128xf32, #tpu.memory_space<vmem>>, vector<4x128xf32>,
    %c1_121 = arith.constant 1 : index
    %c0_122 = arith.constant 0 : index
    %c118_123 = arith.constant 118 : index
    %104 = vector.load %arg5[%c1_121, %c0_122, %c118_123] : memref<4x4x384xf32, #tpu.memory_space<vmem>>, vector<1x4x128xf32>
    %105 = vector.shape_cast %104 : vector<1x4x128xf32> to vector<4x128xf32>
    %c4_124 = arith.constant 4 : index
    %c0_125 = arith.constant 0 : index
    %106 = vector.load %arg6[%c4_124, %c0_125] : memref<128x128xf32, #tpu.memory_space<vmem>>, vector<4x128xf32>
    tpu.vector_store %arg6[%c4_124, %c0_125], %105 {strides = array<i32>} : memref<128x128xf32, #tpu.memory_space<vmem>>, vector<4x128xf32>,
    %c1_126 = arith.constant 1 : index
    %c0_127 = arith.constant 0 : index
    %c119_128 = arith.constant 119 : index
    %107 = vector.load %arg5[%c1_126, %c0_127, %c119_128] : memref<4x4x384xf32, #tpu.memory_space<vmem>>, vector<1x4x128xf32>
    %108 = vector.shape_cast %107 : vector<1x4x128xf32> to vector<4x128xf32>
    %c8_129 = arith.constant 8 : index
    %c0_130 = arith.constant 0 : index
    %109 = vector.load %arg6[%c8_129, %c0_130] : memref<128x128xf32, #tpu.memory_space<vmem>>, vector<4x128xf32>
    tpu.vector_store %arg6[%c8_129, %c0_130], %108 {strides = array<i32>} : memref<128x128xf32, #tpu.memory_space<vmem>>, vector<4x128xf32>,
    %c1_131 = arith.constant 1 : index
    %c0_132 = arith.constant 0 : index
    %c127_133 = arith.constant 127 : index
    %110 = vector.load %arg5[%c1_131, %c0_132, %c127_133] : memref<4x4x384xf32, #tpu.memory_space<vmem>>, vector<1x4x128xf32>
    %111 = vector.shape_cast %110 : vector<1x4x128xf32> to vector<4x128xf32>
    %c12_134 = arith.constant 12 : index
    %c0_135 = arith.constant 0 : index
    %112 = vector.load %arg6[%c12_134, %c0_135] : memref<128x128xf32, #tpu.memory_space<vmem>>, vector<4x128xf32>
    tpu.vector_store %arg6[%c12_134, %c0_135], %111 {strides = array<i32>} : memref<128x128xf32, #tpu.memory_space<vmem>>, vector<4x128xf32>,
    %c1_136 = arith.constant 1 : index
    %c0_137 = arith.constant 0 : index
    %c128_138 = arith.constant 128 : index
    %113 = vector.load %arg5[%c1_136, %c0_137, %c128_138] : memref<4x4x384xf32, #tpu.memory_space<vmem>>, vector<1x4x128xf32>
    %114 = vector.shape_cast %113 : vector<1x4x128xf32> to vector<4x128xf32>
    %c16_139 = arith.constant 16 : index
    %c0_140 = arith.constant 0 : index
    %115 = vector.load %arg6[%c16_139, %c0_140] : memref<128x128xf32, #tpu.memory_space<vmem>>, vector<4x128xf32>
    tpu.vector_store %arg6[%c16_139, %c0_140], %114 {strides = array<i32>} : memref<128x128xf32, #tpu.memory_space<vmem>>, vector<4x128xf32>,
    %c1_141 = arith.constant 1 : index
    %c0_142 = arith.constant 0 : index
    %c129_143 = arith.constant 129 : index
    %116 = vector.load %arg5[%c1_141, %c0_142, %c129_143] : memref<4x4x384xf32, #tpu.memory_space<vmem>>, vector<1x4x128xf32>
    %117 = vector.shape_cast %116 : vector<1x4x128xf32> to vector<4x128xf32>
    %c20_144 = arith.constant 20 : index
    %c0_145 = arith.constant 0 : index
    %118 = vector.load %arg6[%c20_144, %c0_145] : memref<128x128xf32, #tpu.memory_space<vmem>>, vector<4x128xf32>
    tpu.vector_store %arg6[%c20_144, %c0_145], %117 {strides = array<i32>} : memref<128x128xf32, #tpu.memory_space<vmem>>, vector<4x128xf32>,
    %c1_146 = arith.constant 1 : index
    %c0_147 = arith.constant 0 : index
    %c137_148 = arith.constant 137 : index
    %119 = vector.load %arg5[%c1_146, %c0_147, %c137_148] : memref<4x4x384xf32, #tpu.memory_space<vmem>>, vector<1x4x128xf32>
    %120 = vector.shape_cast %119 : vector<1x4x128xf32> to vector<4x128xf32>
    %c24_149 = arith.constant 24 : index
    %c0_150 = arith.constant 0 : index
    %121 = vector.load %arg6[%c24_149, %c0_150] : memref<128x128xf32, #tpu.memory_space<vmem>>, vector<4x128xf32>
    tpu.vector_store %arg6[%c24_149, %c0_150], %120 {strides = array<i32>} : memref<128x128xf32, #tpu.memory_space<vmem>>, vector<4x128xf32>,
    %c1_151 = arith.constant 1 : index
    %c0_152 = arith.constant 0 : index
    %c138_153 = arith.constant 138 : index
    %122 = vector.load %arg5[%c1_151, %c0_152, %c138_153] : memref<4x4x384xf32, #tpu.memory_space<vmem>>, vector<1x4x128xf32>
    %123 = vector.shape_cast %122 : vector<1x4x128xf32> to vector<4x128xf32>
    %c28_154 = arith.constant 28 : index
    %c0_155 = arith.constant 0 : index
    %124 = vector.load %arg6[%c28_154, %c0_155] : memref<128x128xf32, #tpu.memory_space<vmem>>, vector<4x128xf32>
    tpu.vector_store %arg6[%c28_154, %c0_155], %123 {strides = array<i32>} : memref<128x128xf32, #tpu.memory_space<vmem>>, vector<4x128xf32>,
    %c1_156 = arith.constant 1 : index
    %c0_157 = arith.constant 0 : index
    %c139_158 = arith.constant 139 : index
    %125 = vector.load %arg5[%c1_156, %c0_157, %c139_158] : memref<4x4x384xf32, #tpu.memory_space<vmem>>, vector<1x4x128xf32>
    %126 = vector.shape_cast %125 : vector<1x4x128xf32> to vector<4x128xf32>
    %c32_159 = arith.constant 32 : index
    %c0_160 = arith.constant 0 : index
    %127 = vector.load %arg6[%c32_159, %c0_160] : memref<128x128xf32, #tpu.memory_space<vmem>>, vector<4x128xf32>
    tpu.vector_store %arg6[%c32_159, %c0_160], %126 {strides = array<i32>} : memref<128x128xf32, #tpu.memory_space<vmem>>, vector<4x128xf32>,
    %c2_161 = arith.constant 2 : index
    %c0_162 = arith.constant 0 : index
    %c117_163 = arith.constant 117 : index
    %128 = vector.load %arg5[%c2_161, %c0_162, %c117_163] : memref<4x4x384xf32, #tpu.memory_space<vmem>>, vector<1x4x128xf32>
    %129 = vector.shape_cast %128 : vector<1x4x128xf32> to vector<4x128xf32>
    %c36_164 = arith.constant 36 : index
    %c0_165 = arith.constant 0 : index
    %130 = vector.load %arg6[%c36_164, %c0_165] : memref<128x128xf32, #tpu.memory_space<vmem>>, vector<4x128xf32>
    tpu.vector_store %arg6[%c36_164, %c0_165], %129 {strides = array<i32>} : memref<128x128xf32, #tpu.memory_space<vmem>>, vector<4x128xf32>,
    %c2_166 = arith.constant 2 : index
    %c0_167 = arith.constant 0 : index
    %c118_168 = arith.constant 118 : index
    %131 = vector.load %arg5[%c2_166, %c0_167, %c118_168] : memref<4x4x384xf32, #tpu.memory_space<vmem>>, vector<1x4x128xf32>
    %132 = vector.shape_cast %131 : vector<1x4x128xf32> to vector<4x128xf32>
    %c40_169 = arith.constant 40 : index
    %c0_170 = arith.constant 0 : index
    %133 = vector.load %arg6[%c40_169, %c0_170] : memref<128x128xf32, #tpu.memory_space<vmem>>, vector<4x128xf32>
    tpu.vector_store %arg6[%c40_169, %c0_170], %132 {strides = array<i32>} : memref<128x128xf32, #tpu.memory_space<vmem>>, vector<4x128xf32>,
    %c2_171 = arith.constant 2 : index
    %c0_172 = arith.constant 0 : index
    %c119_173 = arith.constant 119 : index
    %134 = vector.load %arg5[%c2_171, %c0_172, %c119_173] : memref<4x4x384xf32, #tpu.memory_space<vmem>>, vector<1x4x128xf32>
    %135 = vector.shape_cast %134 : vector<1x4x128xf32> to vector<4x128xf32>
    %c44_174 = arith.constant 44 : index
    %c0_175 = arith.constant 0 : index
    %136 = vector.load %arg6[%c44_174, %c0_175] : memref<128x128xf32, #tpu.memory_space<vmem>>, vector<4x128xf32>
    tpu.vector_store %arg6[%c44_174, %c0_175], %135 {strides = array<i32>} : memref<128x128xf32, #tpu.memory_space<vmem>>, vector<4x128xf32>,
    %c2_176 = arith.constant 2 : index
    %c0_177 = arith.constant 0 : index
    %c127_178 = arith.constant 127 : index
    %137 = vector.load %arg5[%c2_176, %c0_177, %c127_178] : memref<4x4x384xf32, #tpu.memory_space<vmem>>, vector<1x4x128xf32>
    %138 = vector.shape_cast %137 : vector<1x4x128xf32> to vector<4x128xf32>
    %c48_179 = arith.constant 48 : index
    %c0_180 = arith.constant 0 : index
    %139 = vector.load %arg6[%c48_179, %c0_180] : memref<128x128xf32, #tpu.memory_space<vmem>>, vector<4x128xf32>
    tpu.vector_store %arg6[%c48_179, %c0_180], %138 {strides = array<i32>} : memref<128x128xf32, #tpu.memory_space<vmem>>, vector<4x128xf32>,
    %c2_181 = arith.constant 2 : index
    %c0_182 = arith.constant 0 : index
    %c128_183 = arith.constant 128 : index
    %140 = vector.load %arg5[%c2_181, %c0_182, %c128_183] : memref<4x4x384xf32, #tpu.memory_space<vmem>>, vector<1x4x128xf32>
    %141 = vector.shape_cast %140 : vector<1x4x128xf32> to vector<4x128xf32>
    %c52_184 = arith.constant 52 : index
    %c0_185 = arith.constant 0 : index
    %142 = vector.load %arg6[%c52_184, %c0_185] : memref<128x128xf32, #tpu.memory_space<vmem>>, vector<4x128xf32>
    tpu.vector_store %arg6[%c52_184, %c0_185], %141 {strides = array<i32>} : memref<128x128xf32, #tpu.memory_space<vmem>>, vector<4x128xf32>,
    %c2_186 = arith.constant 2 : index
    %c0_187 = arith.constant 0 : index
    %c129_188 = arith.constant 129 : index
    %143 = vector.load %arg5[%c2_186, %c0_187, %c129_188] : memref<4x4x384xf32, #tpu.memory_space<vmem>>, vector<1x4x128xf32>
    %144 = vector.shape_cast %143 : vector<1x4x128xf32> to vector<4x128xf32>
    %c56_189 = arith.constant 56 : index
    %c0_190 = arith.constant 0 : index
    %145 = vector.load %arg6[%c56_189, %c0_190] : memref<128x128xf32, #tpu.memory_space<vmem>>, vector<4x128xf32>
    tpu.vector_store %arg6[%c56_189, %c0_190], %144 {strides = array<i32>} : memref<128x128xf32, #tpu.memory_space<vmem>>, vector<4x128xf32>,
    %c2_191 = arith.constant 2 : index
    %c0_192 = arith.constant 0 : index
    %c137_193 = arith.constant 137 : index
    %146 = vector.load %arg5[%c2_191, %c0_192, %c137_193] : memref<4x4x384xf32, #tpu.memory_space<vmem>>, vector<1x4x128xf32>
    %147 = vector.shape_cast %146 : vector<1x4x128xf32> to vector<4x128xf32>
    %c60_194 = arith.constant 60 : index
    %c0_195 = arith.constant 0 : index
    %148 = vector.load %arg6[%c60_194, %c0_195] : memref<128x128xf32, #tpu.memory_space<vmem>>, vector<4x128xf32>
    tpu.vector_store %arg6[%c60_194, %c0_195], %147 {strides = array<i32>} : memref<128x128xf32, #tpu.memory_space<vmem>>, vector<4x128xf32>,
    %c2_196 = arith.constant 2 : index
    %c0_197 = arith.constant 0 : index
    %c138_198 = arith.constant 138 : index
    %149 = vector.load %arg5[%c2_196, %c0_197, %c138_198] : memref<4x4x384xf32, #tpu.memory_space<vmem>>, vector<1x4x128xf32>
    %150 = vector.shape_cast %149 : vector<1x4x128xf32> to vector<4x128xf32>
    %c64_199 = arith.constant 64 : index
    %c0_200 = arith.constant 0 : index
    %151 = vector.load %arg6[%c64_199, %c0_200] : memref<128x128xf32, #tpu.memory_space<vmem>>, vector<4x128xf32>
    tpu.vector_store %arg6[%c64_199, %c0_200], %150 {strides = array<i32>} : memref<128x128xf32, #tpu.memory_space<vmem>>, vector<4x128xf32>,
    %c2_201 = arith.constant 2 : index
    %c0_202 = arith.constant 0 : index
    %c139_203 = arith.constant 139 : index
    %152 = vector.load %arg5[%c2_201, %c0_202, %c139_203] : memref<4x4x384xf32, #tpu.memory_space<vmem>>, vector<1x4x128xf32>
    %153 = vector.shape_cast %152 : vector<1x4x128xf32> to vector<4x128xf32>
    %c68_204 = arith.constant 68 : index
    %c0_205 = arith.constant 0 : index
    %154 = vector.load %arg6[%c68_204, %c0_205] : memref<128x128xf32, #tpu.memory_space<vmem>>, vector<4x128xf32>
    tpu.vector_store %arg6[%c68_204, %c0_205], %153 {strides = array<i32>} : memref<128x128xf32, #tpu.memory_space<vmem>>, vector<4x128xf32>,
    %c3 = arith.constant 3 : index
    %c0_206 = arith.constant 0 : index
    %c117_207 = arith.constant 117 : index
    %155 = vector.load %arg5[%c3, %c0_206, %c117_207] : memref<4x4x384xf32, #tpu.memory_space<vmem>>, vector<1x4x128xf32>
    %156 = vector.shape_cast %155 : vector<1x4x128xf32> to vector<4x128xf32>
    %c72_208 = arith.constant 72 : index
    %c0_209 = arith.constant 0 : index
    %157 = vector.load %arg6[%c72_208, %c0_209] : memref<128x128xf32, #tpu.memory_space<vmem>>, vector<4x128xf32>
    tpu.vector_store %arg6[%c72_208, %c0_209], %156 {strides = array<i32>} : memref<128x128xf32, #tpu.memory_space<vmem>>, vector<4x128xf32>,
    %c3_210 = arith.constant 3 : index
    %c0_211 = arith.constant 0 : index
    %c118_212 = arith.constant 118 : index
    %158 = vector.load %arg5[%c3_210, %c0_211, %c118_212] : memref<4x4x384xf32, #tpu.memory_space<vmem>>, vector<1x4x128xf32>
    %159 = vector.shape_cast %158 : vector<1x4x128xf32> to vector<4x128xf32>
    %c76_213 = arith.constant 76 : index
    %c0_214 = arith.constant 0 : index
    %160 = vector.load %arg6[%c76_213, %c0_214] : memref<128x128xf32, #tpu.memory_space<vmem>>, vector<4x128xf32>
    tpu.vector_store %arg6[%c76_213, %c0_214], %159 {strides = array<i32>} : memref<128x128xf32, #tpu.memory_space<vmem>>, vector<4x128xf32>,
    %c3_215 = arith.constant 3 : index
    %c0_216 = arith.constant 0 : index
    %c119_217 = arith.constant 119 : index
    %161 = vector.load %arg5[%c3_215, %c0_216, %c119_217] : memref<4x4x384xf32, #tpu.memory_space<vmem>>, vector<1x4x128xf32>
    %162 = vector.shape_cast %161 : vector<1x4x128xf32> to vector<4x128xf32>
    %c80_218 = arith.constant 80 : index
    %c0_219 = arith.constant 0 : index
    %163 = vector.load %arg6[%c80_218, %c0_219] : memref<128x128xf32, #tpu.memory_space<vmem>>, vector<4x128xf32>
    tpu.vector_store %arg6[%c80_218, %c0_219], %162 {strides = array<i32>} : memref<128x128xf32, #tpu.memory_space<vmem>>, vector<4x128xf32>,
    %c3_220 = arith.constant 3 : index
    %c0_221 = arith.constant 0 : index
    %c127_222 = arith.constant 127 : index
    %164 = vector.load %arg5[%c3_220, %c0_221, %c127_222] : memref<4x4x384xf32, #tpu.memory_space<vmem>>, vector<1x4x128xf32>
    %165 = vector.shape_cast %164 : vector<1x4x128xf32> to vector<4x128xf32>
    %c84_223 = arith.constant 84 : index
    %c0_224 = arith.constant 0 : index
    %166 = vector.load %arg6[%c84_223, %c0_224] : memref<128x128xf32, #tpu.memory_space<vmem>>, vector<4x128xf32>
    tpu.vector_store %arg6[%c84_223, %c0_224], %165 {strides = array<i32>} : memref<128x128xf32, #tpu.memory_space<vmem>>, vector<4x128xf32>,
    %c3_225 = arith.constant 3 : index
    %c0_226 = arith.constant 0 : index
    %c128_227 = arith.constant 128 : index
    %167 = vector.load %arg5[%c3_225, %c0_226, %c128_227] : memref<4x4x384xf32, #tpu.memory_space<vmem>>, vector<1x4x128xf32>
    %168 = vector.shape_cast %167 : vector<1x4x128xf32> to vector<4x128xf32>
    %c88_228 = arith.constant 88 : index
    %c0_229 = arith.constant 0 : index
    %169 = vector.load %arg6[%c88_228, %c0_229] : memref<128x128xf32, #tpu.memory_space<vmem>>, vector<4x128xf32>
    tpu.vector_store %arg6[%c88_228, %c0_229], %168 {strides = array<i32>} : memref<128x128xf32, #tpu.memory_space<vmem>>, vector<4x128xf32>,
    %c3_230 = arith.constant 3 : index
    %c0_231 = arith.constant 0 : index
    %c129_232 = arith.constant 129 : index
    %170 = vector.load %arg5[%c3_230, %c0_231, %c129_232] : memref<4x4x384xf32, #tpu.memory_space<vmem>>, vector<1x4x128xf32>
    %171 = vector.shape_cast %170 : vector<1x4x128xf32> to vector<4x128xf32>
    %c92_233 = arith.constant 92 : index
    %c0_234 = arith.constant 0 : index
    %172 = vector.load %arg6[%c92_233, %c0_234] : memref<128x128xf32, #tpu.memory_space<vmem>>, vector<4x128xf32>
    tpu.vector_store %arg6[%c92_233, %c0_234], %171 {strides = array<i32>} : memref<128x128xf32, #tpu.memory_space<vmem>>, vector<4x128xf32>,
    %c3_235 = arith.constant 3 : index
    %c0_236 = arith.constant 0 : index
    %c137_237 = arith.constant 137 : index
    %173 = vector.load %arg5[%c3_235, %c0_236, %c137_237] : memref<4x4x384xf32, #tpu.memory_space<vmem>>, vector<1x4x128xf32>
    %174 = vector.shape_cast %173 : vector<1x4x128xf32> to vector<4x128xf32>
    %c96_238 = arith.constant 96 : index
    %c0_239 = arith.constant 0 : index
    %175 = vector.load %arg6[%c96_238, %c0_239] : memref<128x128xf32, #tpu.memory_space<vmem>>, vector<4x128xf32>
    tpu.vector_store %arg6[%c96_238, %c0_239], %174 {strides = array<i32>} : memref<128x128xf32, #tpu.memory_space<vmem>>, vector<4x128xf32>,
    %c3_240 = arith.constant 3 : index
    %c0_241 = arith.constant 0 : index
    %c138_242 = arith.constant 138 : index
    %176 = vector.load %arg5[%c3_240, %c0_241, %c138_242] : memref<4x4x384xf32, #tpu.memory_space<vmem>>, vector<1x4x128xf32>
    %177 = vector.shape_cast %176 : vector<1x4x128xf32> to vector<4x128xf32>
    %c100_243 = arith.constant 100 : index
    %c0_244 = arith.constant 0 : index
    %178 = vector.load %arg6[%c100_243, %c0_244] : memref<128x128xf32, #tpu.memory_space<vmem>>, vector<4x128xf32>
    tpu.vector_store %arg6[%c100_243, %c0_244], %177 {strides = array<i32>} : memref<128x128xf32, #tpu.memory_space<vmem>>, vector<4x128xf32>,
    %c3_245 = arith.constant 3 : index
    %c0_246 = arith.constant 0 : index
    %c139_247 = arith.constant 139 : index
    %179 = vector.load %arg5[%c3_245, %c0_246, %c139_247] : memref<4x4x384xf32, #tpu.memory_space<vmem>>, vector<1x4x128xf32>
    %180 = vector.shape_cast %179 : vector<1x4x128xf32> to vector<4x128xf32>
    %c104_248 = arith.constant 104 : index
    %c0_249 = arith.constant 0 : index
    %181 = vector.load %arg6[%c104_248, %c0_249] : memref<128x128xf32, #tpu.memory_space<vmem>>, vector<4x128xf32>
    tpu.vector_store %arg6[%c104_248, %c0_249], %180 {strides = array<i32>} : memref<128x128xf32, #tpu.memory_space<vmem>>, vector<4x128xf32>,
    %c0_250 = arith.constant 0 : index
    %c0_251 = arith.constant 0 : index
    %182 = vector.load %arg6[%c0_250, %c0_251] : memref<128x128xf32, #tpu.memory_space<vmem>>, vector<128x128xf32>
    %cst_252 = arith.constant dense<0.000000e+00> : vector<8x128xf32>
    %183 = tpu.matmul %14, %182, %cst_252 {dimension_numbers = #tpu.dot_dimension_numbers<[1], [0], [0], [1], [0, 0, 1, 1], [], []>} : vector<8x128xf32>, vector<128x128xf32>, vector<8x128xf32> -> vector<8x128xf32>
    %c0_253 = arith.constant 0 : index
    %c1_254 = arith.constant 1 : index
    %c0_255 = arith.constant 0 : index
    %c0_256 = arith.constant 0 : index
    %184 = vector.load %arg4[%c0_253, %c1_254, %c0_255, %c0_256] : memref<1x2x8x128xf32, #tpu.memory_space<vmem>>, vector<1x1x8x128xf32>
    %185 = vector.shape_cast %184 : vector<1x1x8x128xf32> to vector<8x128xf32>
    %186 = vector.shape_cast %183 : vector<8x128xf32> to vector<1x1x8x128xf32>
    tpu.vector_store %arg4[%c0_253, %c1_254, %c0_255, %c0_256], %186 {strides = array<i32>} : memref<1x2x8x128xf32, #tpu.memory_space<vmem>>, vector<1x1x8x128xf32>,
    return
  }
  func.func @transform_0(%arg0: i32, %arg1: i32) -> (i32, i32, i32) {
    %c0_i32 = arith.constant 0 : i32
    %c0_i32_0 = arith.constant 0 : i32
    %c0_i32_1 = arith.constant 0 : i32
    return %arg0, %c0_i32, %c0_i32_0 : i32, i32, i32
  }
  func.func @transform_2(%arg0: i32, %arg1: i32) -> (i32, i32, i32, i32) {
    %c0_i32 = arith.constant 0 : i32
    %c0_i32_0 = arith.constant 0 : i32
    %c0_i32_1 = arith.constant 0 : i32
    return %arg0, %arg1, %c0_i32, %c0_i32_0 : i32, i32, i32, i32
  }
}

</mosaic_0001>

<bundles_post_ra>
// kernel: tpu_custom_call.1
= control target key start
LH: loop header
LB: loop body
LE: loop exit
PB: predicated region body
PF: predicated region fallthrough
CT: control target
= control target key end

     0   :  { %s1909_s0 = inlined_call_operand.hbm [shape: f32[2,8,128], index: 0, kind: input, shape index: {}]   ;;  %s1910_s1 = inlined_call_operand.hbm [shape: f32[2,6,4,384], index: 1, kind: input, shape index: {}]   ;;  %s1911_s2 = inlined_call_operand.hbm [shape: f32[2,4,8,128], index: 2, kind: output, shape index: {}]  }
   0x1   :  { %1918 = sst [smem:[#allocation20_spill]] %s1909_s0 }
   0x2   :  { %7 = vsyncpa [#allocation6], 0 }
   0x3   :  { %9 = vsyncpa [#allocation6 + $0x1], 0 }
   0x4   :  { %10 = vsyncpa [#allocation7], 0 }
   0x5   :  { %12 = vsyncpa [#allocation7 + $0x1], 0  ;;  %s1476_s9 = smov 0   ;;  %s1478_s10 = smov 0  }
   0x6   :  { %s1480_s11 = smov 0   ;;  %s1482_s12 = smov 0  }
   0x7   :  { %s1484_s13 = smov 0   ;;  %s1486_s14 = smov 0  }
   0x8   :  { %s1488_s15 = smov 0   ;;  %s1490_s16 = smov 0  }
   0x9   :  { %s1492_s17 = smov 0   ;;  %s1494_s18 = smov 0  }
   0xa   :  { %s1496_s19 = smov 0  }
   0xb LB: > { %1919 = sst [smem:[#allocation16_spill]] %s1434_s17  ;;  %s967_s20 = sadd.s32 4294967295, %s1442_s19   ;;  %s1442_s19 = sphi %s1496_s19, %s18_s19   ;;  %s1438_s18 = sphi %s1494_s18, %s1938_s18   ;;  %s1434_s17 = sphi %s1492_s17, %s1937_s17   ;;  %s1430_s16 = sphi %s1490_s16, %s1936_s16   ;;  %s1426_s15 = sphi %s1488_s15, %s1935_s15   ;;  %s1422_s14 = sphi %s1486_s14, %s1944_s14   ;;  %s1418_s13 = sphi %s1484_s13, %s1943_s13   ;;  %s1414_s12 = sphi %s1482_s12, %s1942_s12   ;;  %s1410_s11 = sphi %s1480_s11, %s1941_s11   ;;  %s1406_s10 = sphi %s1478_s10, %s1940_s10   ;;  %s1402_s9 = sphi %s1476_s9, %s1939_s9  }
   0xc   : > { %1920 = sst [smem:[#allocation17_spill]] %s1438_s18  ;;  %s968_s21 = sadd.s32 4294967294, %s1442_s19  }
   0xd   : > { %s27_s22 = sadd.s32 1, %s1434_s17  ;;  %s30_s23 = sadd.s32 1, %s1438_s18 }
   0xe   : > { %p28_p0 = scmp.ge.s32.totalorder %s27_s22, 2  ;;  %s37_s24 = sadd.s32 1, %s1422_s14 }
   0xf   : > { %p44_p1 = scmp.ne.s32.totalorder %s1422_s14, %s1418_s13  ;;  %p45_p2 = scmp.eq.s32.totalorder %s1442_s19, 0 }
  0x10   : > { %s1946_s22 = smov (%p28_p0, %s27_s22), 0  ;;  %s1948_s23 = smov (!%p28_p0, %s30_s23), %s1438_s18 }
  0x11   : > { %1921 = sst [smem:[#allocation18_spill]] %s1946_s22  ;;  %p1540_p3 = por %p45_p2, %p44_p1 }
  0x12   : > { %p50_p4 = scmp.ne.s32.totalorder %s1418_s13, %s1414_s12  ;;  %p32_p5 = scmp.ge.s32.totalorder %s1948_s23, 2 }
  0x13   : > { %p51_p6 = scmp.eq.s32.totalorder %s967_s20, 0  ;;  %s61_s26 = ssub.s32 %s1434_s17, %s1946_s22 }
  0x14   : > { %s65_s27 = sadd.s32 1, %s1410_s11  ;;  %s1950_s23 = smov (%p32_p5, %s1948_s23), 0 }
  0x15   : > { %1923 = sst [smem:[#allocation19_spill]] %s1950_s23  ;;  %p1550_p7 = por %p51_p6, %p50_p4 }
  0x16   : > { %p75_p8 = scmp.ne.s32.totalorder %s1410_s11, %s1406_s10  ;;  %s34_s29 = ssub.s32 %s1438_s18, %s1950_s23 }
  0x17   : > { %p76_p9 = scmp.eq.s32.totalorder %s967_s20, 3  ;;  %p35_p10 = scmp.eq.s32.totalorder %s34_s29, 0 }
  0x18   : > { %s62_s30 = sor.u32 %s61_s26, %s34_s29  ;;  %p81_p13 = scmp.ne.s32.totalorder %s1406_s10, %s1402_s9 }
  0x19   : > { %p63_p11 = scmp.eq.s32.totalorder %s62_s30, 0  ;;  %p1558_p12 = por %p76_p9, %p75_p8 }
  0x1a   : > { %s1563_s4 = scalar_select %p35_p10, %s1422_s14, %s37_s24  }
  0x1b   : > { %s1925_s3 = scalar_select %p1558_p12, 1, 0 }
  0x1c   : > { %s1566_s5 = scalar_select %p63_p11, %s1410_s11, %s65_s27  }
  0x1d   : > { %p82_p0 = scmp.eq.s32.totalorder %s968_s21, 3  ;;  %p1151_p1 = scmp.lt.s32.totalorder %s1442_s19, 4 }
  0x1e   : > { %s102_s7 = sand.u32 1, %s1422_s14   ;;  %s972_s12 = sshll.u32 %s1438_s18, 7 }
  0x1f   : > { %p1571_p2 = por %p82_p0, %p81_p13  ;;  %s971_s8 = sshll.u32 %s102_s7, 3 }
  0x20   : > { %s1927_s0 = sld [smem:[#allocation20_spill]]  ;;  %s106_s24 = scalar_lea.vmem [#allocation5], %s971_s8 }
  0x21   : > { %s1926_s6 = scalar_select %p1571_p2, 1, 0 }
  0x22   : > { %s113_s27 = sshll.u32 %s106_s24, 4  ;;  %p1586_p4 = pnand %p1151_p1, %p1540_p3  ;;  %s1582_s27 = int_to_ptr.vmem [resolvable:$true] %s113_s27 }
  0x23   : > { %s103_s30 = scalar_lea.sflag [#allocation6], %s102_s7 }
  0x24   : > { %p1266_p9 = pneg %p1586_p4 }
  0x26   : > { %s1580_s29 = scalar_lea.hbm %s1927_s0, %s972_s12  ;;  %s1269_s25 = scalar_lea.hbm %s1927_s0, 256 }
  0x27   : > { %s1264_s12 = scalar_lea.hbm %s1580_s29, 128  ;;  %p1270_p3 = scmp.lt.u32.totalorder %s1580_s29, %s1927_s0 }
  0x28   : > { %p1265_p8 = scmp.ne.s32.totalorder %s1580_s29, %s1264_s12  ;;  %p1271_p13 = scmp.lt.u32.totalorder %s1269_s25, %s1264_s12 }
  0x29   : > { %p1273_p1 = scmp.lt.u32.totalorder %s1264_s12, %s1580_s29 }
  0x2a   : > { %p1267_p10 = pnand %p1266_p9, %p1265_p8  ;;  %p1272_p0 = por %p1271_p13, %p1270_p3 }
  0x2c   : > { %p1268_p11 = pneg %p1267_p10  ;;  %p1274_p5 = por %p1273_p1, %p1272_p0 }
  0x2e   : > { %p1275_p6 = pnand %p1274_p5, %p1268_p11 }
  0x30   : > { %1278 = shalt.err (!%p1275_p6)
}
  0x31   : > { %s1279_s7 = scalar_lea.vmem %s1582_s27, 128  ;;  %s1444_s8 = smov [#allocation5]  }
  0x32   : > { %p1280_p8 = scmp.ne.s32.totalorder %s1582_s27, %s1279_s7  ;;  %s1284_s20 = sshll.u32 %s1444_s8, 4  ;;  %s1285_s20 = int_to_ptr.vmem [resolvable:$false] %s1284_s20 }
  0x33   : > { %s1286_s26 = scalar_lea.vmem %s1285_s20, 256  ;;  %p1287_p12 = scmp.lt.s32.totalorder %s1582_s27, %s1285_s20 }
  0x34   : > { %p1282_p10 = pnand %p1280_p8, %p1266_p9  ;;  %p1288_p3 = scmp.lt.s32.totalorder %s1286_s26, %s1279_s7 }
  0x36   : > { %p1283_p2 = pneg %p1282_p10  ;;  %p1289_p13 = por %p1288_p3, %p1287_p12 }
  0x38   : > { %p1290_p0 = pnand %p1289_p13, %p1283_p2 }
  0x3a   : > { %1293 = shalt.err (!%p1290_p0)
}
  0x3b   : > { %1146 = dma.hbm_to_vmem [thread:$0]  (!%p1586_p4), %s1580_s29, 128, %s1582_s27, %s103_s30  }
  0x3c   : > { %p1929_p5 = scmp.lt.s32.totalorder %s1442_s19, 5  ;;  %p1930_p6 = scmp.ge.s32.totalorder %s1442_s19, 1 }
  0x3e   : > { %p119_p9 = pnand %p1930_p6, %p1929_p5 }
  0x3f   : > { %s124_s12 = sand.u32 (!%p119_p9), 1, %s1418_s13  }
  0x40   : > { %122 = sbr.rel (%p119_p9) target bundleno = 648 (0x288), region = 24  ;;  %s1622_s25 = sshll.u32 (!%p119_p9), %s124_s12, 3 }
  0x41   : > { %s125_s24 = scalar_lea.sflag (!%p119_p9), [#allocation6], %s124_s12 }
  0x47   : > { %1391 = dma.done.wait (%p1550_p7), %s125_s24, 128  }
  0x48   : > { %1393 = vsyncadd (%p1550_p7), %s125_s24, 4294967168  ;;  %s1917_s29 = sand.u32 1, %s1406_s10   ;;  %s977_s27 = smul.u32 6, %s1426_s15  ;;  %v1445_v0 = vmov 0.0   ;;  %v1446_v1 = vmov 1.0  }
  0x49   : > { %165 = vst [vmem:[#allocation3 + $0x6c] sm:$0xff] %v1445_v0  ;;  %166 = vst [vmem:[#allocation3 + $0x74] sm:$0xff] %v1445_v0  ;;  %s975_s21 = sshll.u32 %s1917_s29, 4  ;;  %s150_s30 = smul.u32 18, %s1430_s16 }
  0x4a   : > { %167 = vst [vmem:[#allocation3 + $0x7c] sm:$0xf] %v1445_v0  ;;  %168 = vst [vmem:[#allocation3 + $0x6c] sm:$0x1] %v1446_v1  ;;  %s1447_s8 = smov [#allocation2]   ;;  %s1296_s18 = scalar_lea.hbm %s1910_s1, 2304 }
  0x4b   : > { %s151_s28 = sadd.s32 %s977_s27, %s150_s30  ;;  %s161_s20 = sshll.u32 %s1447_s8, 4  ;;  %s162_s20 = int_to_ptr.vmem [resolvable:$true] %s161_s20 }
  0x4c   : > { %s978_s26 = sshll.u32 %s151_s28, 6 }
  0x4d   : > { %s153_s7 = scalar_lea.hbm %s1910_s1, %s978_s26 }
  0x4e   : > { %s1294_s0 = scalar_lea.hbm %s153_s7, 768  ;;  %p1297_p12 = scmp.lt.u32.totalorder %s153_s7, %s1910_s1 }
  0x4f   : > { %p1295_p7 = scmp.ne.s32.totalorder %s153_s7, %s1294_s0  ;;  %p1298_p2 = scmp.lt.u32.totalorder %s1296_s18, %s1294_s0 }
  0x50   : > { %p1300_p11 = scmp.lt.u32.totalorder %s1294_s0, %s153_s7 }
  0x51   : > { %p1299_p4 = por %p1298_p2, %p1297_p12 }
  0x53   : > { %p1301_p1 = por %p1300_p11, %p1299_p4 }
  0x55   : > { %p1302_p8 = pnand %p1301_p1, %p1295_p7 }
  0x57   : > { %1305 = shalt.err (!%p1302_p8)  }
  0x58   : > { %s1306_s27 = scalar_lea.vmem %s162_s20, 768  ;;  %p1311_p3 = scmp.lt.s32.totalorder %s162_s20, %s162_s20 }
  0x59   : > { %p1307_p10 = scmp.ne.s32.totalorder %s162_s20, %s1306_s27  ;;  %p1312_p13 = scmp.lt.s32.totalorder %s1306_s27, %s1306_s27 }
  0x5b   : > { %p1313_p0 = por %p1312_p13, %p1311_p3 }
  0x5d   : > { %p1314_p5 = pnand %p1313_p0, %p1307_p10 }
  0x5f   : > { %1317 = shalt.err (!%p1314_p5)  }
  0x60   : > { %164 = dma.hbm_to_vmem [thread:$0]  %s153_s7, 768, %s162_s20, [#allocation4] }
  0x61   : > { %s1646_s22 = scalar_lea.vmem [#allocation8], %s975_s21 }
  0x62   : > { %1394 = dma.done.wait [#allocation4], 768 }
  0x63   : > { %1395 = vsyncadd [#allocation4], 4294966528  ;;  %v186_v2 = vld [vmem:[#allocation2] sm:$0xff]  ;;  %s1448_s17 = smov 10   ;;  %s1449_s0 = smov 11   ;;  %v1451_v6 = vmov 0.0|0.0  }
  0x64   : > { %189 = vrot.lane.b32.xlu1 %v186_v2, %s1448_s17  ;;  %v188_v3 = vcombine.high %v186_v2, %v186_v2  ;;  %178 = vrot.lane.b32.xlu0 %v186_v2, %s1449_s0  ;;  %v219_v4 = vld [vmem:[#allocation2 + $0x4] sm:$0xf]  ;;  %s1450_s18 = smov 9   ;;  %s1452_s23 = smov 1   ;;  %v266_v8 = vld [vmem:[#allocation2 + $0xc] sm:$0xff]  ;;  %v349_v13 = vld [vmem:[#allocation2 + $0x18] sm:$0xff] }
  0x65   : > { %220 = vst [vmem:[#allocation3 + $0x10] sm:$0xf] %v219_v4  ;;  %v221_v5 = vld [vmem:[#allocation2 + $0x4] sm:$0xff]  ;;  %1091 = vmatprep.subr.bf16.mxu0 %v1451_v6  ;;  %1115 = vmatprep.subr.bf16.mxu1 %v1451_v6  ;;  %s1453_s7 = smov 127   ;;  %s1454_s29 = smov 119   ;;  %v268_v9 = vcombine.high %v266_v8, %v266_v8  ;;  %v308_v11 = vld [vmem:[#allocation2 + $0x10] sm:$0xff]  ;;  %v351_v14 = vcombine.high %v349_v13, %v349_v13 }
  0x66   : > { %v223_v7 = vcombine.high %v221_v5, %v221_v5  ;;  %s1455_s21 = smov 118   ;;  %s1456_s30 = smov 117   ;;  %v306_v10 = vld [vmem:[#allocation2 + $0x10] sm:$0xf]  ;;  %v310_v12 = vcombine.high %v308_v11, %v308_v11  ;;  %v389_v15 = vld [vmem:[#allocation2 + $0x1c] sm:$0xf] }
  0x67   : > { %307 = vst [vmem:[#allocation3 + $0x34] sm:$0xf] %v306_v10  ;;  %390 = vst [vmem:[#allocation3 + $0x58] sm:$0xf] %v389_v15  ;;  %vm193_vm0 = vcmask 80896   ;;  %v1710_v18 = vld [vmem:[#allocation2 + $0x1c] sm:$0xff] }
  0x68   : > { %191 = vrot.lane.b32.xlu1 %v188_v3, %s1448_s17  ;;  %200 = vrot.lane.b32.xlu0 %v186_v2, %s1450_s18  ;;  %vm204_vm1 = vcmask 72704   ;;  %vm182_vm2 = vcmask 89088   ;;  %v1717_v22 = vcombine.high %v1710_v18, %v1710_v18  ;;  %vm215_vm3 = vcmask 7168   ;;  %v558_v39 = vld [vmem:[#allocation2 + $0x10] sm:$0xf]  ;;  %v683_v55 = vld [vmem:[#allocation2 + $0x24] sm:$0xff] }
  0x69   : > { %vm228_vm4 = vcmask 1039360   ;;  %vm239_vm5 = vcmask 973824   ;;  %vm250_vm6 = vcmask 965632   ;;  %vm261_vm7 = vcmask 957440   ;;  %v725_v10 = vld [vmem:[#allocation2 + $0x28] sm:$0xff]  ;;  %s1931_s28 = scalar_lea.vmem [#allocation5], %s1622_s25 }
  0x6a   : > { %v685_v59 = vcombine.high %v683_v55, %v683_v55  ;;  %vm1457_vm8 = vmmov 0   ;;  %s981_s25 = sshll.u32 %s1426_s15, 1  ;;  %s982_s8 = sshll.u32 %s1430_s16, 2 }
  0x6b   : > { %1053 = vmatprep.mubr.msk.f32.mxu0 %vm1457_vm8, %v1445_v0  ;;  %1088 = vmatprep.mubr.msk.f32.mxu1 %vm1457_vm8, %v1445_v0  ;;  %s866_s20 = sadd.s32 %s982_s8, %s981_s25  ;;  %s869_s12 = sshll.u32 %s1646_s22, 4  ;;  %s1843_s12 = int_to_ptr.vmem [resolvable:$true] %s869_s12 }
  0x6c   : > { %202 = vrot.lane.b32.xlu1 %v188_v3, %s1450_s18  ;;  %180 = vrot.lane.b32.xlu0 %v188_v3, %s1449_s0  ;;  %s983_s26 = sshll.u32 %s866_s20, 7  ;;  %s1318_s15 = scalar_lea.vmem %s1843_s12, 256 }
  0x6d   : > { %p1319_p6 = scmp.ne.s32.totalorder %s1843_s12, %s1318_s15  ;;  %p1933_p9 = scmp.ne.s32.totalorder %s1925_s3, 0 }
  0x6e   : > { %s1458_s16 = smov [#allocation8]  }
  0x6f   : > { %p1320_p7 = pnand %p1319_p6, %p1933_p9 }
  0x70   : > { %213 = vrot.lane.b32.xlu1 %v188_v3, %s1452_s23  ;;  %211 = vrot.lane.b32.xlu0 %v186_v2, %s1452_s23 }
  0x71   : > { %p1321_p12 = pneg %p1320_p7 }
  0x74   : > { %226 = vrot.lane.b32.xlu1 %v223_v7, %s1453_s7  ;;  %224 = vrot.lane.b32.xlu0 %v221_v5, %s1453_s7 }
  0x78   : > { %237 = vrot.lane.b32.xlu1 %v223_v7, %s1454_s29  ;;  %235 = vrot.lane.b32.xlu0 %v221_v5, %s1454_s29 }
  0x7c   : > { %248 = vrot.lane.b32.xlu1 %v223_v7, %s1455_s21  ;;  %246 = vrot.lane.b32.xlu0 %v221_v5, %s1455_s21 }
  0x80   : > { %259 = vrot.lane.b32.xlu1 %v223_v7, %s1456_s30  ;;  %257 = vrot.lane.b32.xlu0 %v221_v5, %s1456_s30 }
  0x84   : > { %271 = vrot.lane.b32.xlu1 %v268_v9, %s1449_s0  ;;  %269 = vrot.lane.b32.xlu0 %v266_v8, %s1449_s0 }
  0x88   : > { %281 = vrot.lane.b32.xlu1 %v268_v9, %s1448_s17  ;;  %279 = vrot.lane.b32.xlu0 %v266_v8, %s1448_s17 }
  0x8c   : > { %291 = vrot.lane.b32.xlu1 %v268_v9, %s1450_s18  ;;  %289 = vrot.lane.b32.xlu0 %v266_v8, %s1450_s18 }
  0x90   : > { %523 = vrot.lane.b32.xlu1 %v268_v9, %s1449_s0  ;;  %521 = vrot.lane.b32.xlu0 %v266_v8, %s1449_s0 }
  0x94   : > { %533 = vrot.lane.b32.xlu1 %v268_v9, %s1448_s17  ;;  %531 = vrot.lane.b32.xlu0 %v266_v8, %s1448_s17 }
  0x98   : > { %543 = vrot.lane.b32.xlu1 %v268_v9, %s1450_s18  ;;  %541 = vrot.lane.b32.xlu0 %v266_v8, %s1450_s18 }
  0x9c   : > { %553 = vrot.lane.b32.xlu1 %v268_v9, %s1452_s23  ;;  %551 = vrot.lane.b32.xlu0 %v266_v8, %s1452_s23 }
  0xa0   : > { %301 = vrot.lane.b32.xlu1 %v268_v9, %s1452_s23  ;;  %299 = vrot.lane.b32.xlu0 %v266_v8, %s1452_s23 }
  0xa4   : > { %313 = vrot.lane.b32.xlu1 %v310_v12, %s1453_s7  ;;  %311 = vrot.lane.b32.xlu0 %v308_v11, %s1453_s7 }
  0xa8   : > { %323 = vrot.lane.b32.xlu1 %v310_v12, %s1454_s29  ;;  %321 = vrot.lane.b32.xlu0 %v308_v11, %s1454_s29 }
  0xac   : > { %565 = vrot.lane.b32.xlu1 %v310_v12, %s1453_s7  ;;  %563 = vrot.lane.b32.xlu0 %v308_v11, %s1453_s7 }
  0xb0   : > { %575 = vrot.lane.b32.xlu1 %v310_v12, %s1454_s29  ;;  %573 = vrot.lane.b32.xlu0 %v308_v11, %s1454_s29 }
  0xb4   : > { %585 = vrot.lane.b32.xlu1 %v310_v12, %s1455_s21  ;;  %583 = vrot.lane.b32.xlu0 %v308_v11, %s1455_s21 }
  0xb8   : > { %333 = vrot.lane.b32.xlu1 %v310_v12, %s1455_s21  ;;  %331 = vrot.lane.b32.xlu0 %v308_v11, %s1455_s21 }
  0xbc   : > { %343 = vrot.lane.b32.xlu1 %v310_v12, %s1456_s30  ;;  %341 = vrot.lane.b32.xlu0 %v308_v11, %s1456_s30 }
  0xc0   : > { %354 = vrot.lane.b32.xlu1 %v351_v14, %s1449_s0  ;;  %352 = vrot.lane.b32.xlu0 %v349_v13, %s1449_s0 }
  0xc4   : > { %364 = vrot.lane.b32.xlu1 %v351_v14, %s1448_s17  ;;  %362 = vrot.lane.b32.xlu0 %v349_v13, %s1448_s17 }
  0xc8   : > { %595 = vrot.lane.b32.xlu1 %v310_v12, %s1456_s30  ;;  %593 = vrot.lane.b32.xlu0 %v308_v11, %s1456_s30 }
  0xcc   : > { %605 = vrot.lane.b32.xlu1 %v351_v14, %s1449_s0  ;;  %603 = vrot.lane.b32.xlu0 %v349_v13, %s1449_s0 }
  0xd0   : > { %615 = vrot.lane.b32.xlu1 %v351_v14, %s1448_s17  ;;  %613 = vrot.lane.b32.xlu0 %v349_v13, %s1448_s17 }
  0xd4   : > { %625 = vrot.lane.b32.xlu1 %v351_v14, %s1450_s18  ;;  %623 = vrot.lane.b32.xlu0 %v349_v13, %s1450_s18 }
  0xd6   : > { %v190_v16 = vpop.permute.xlu1 %189  ;;  %v179_v17 = vpop.permute.xlu0 %178 }
  0xd8   : > { %374 = vrot.lane.b32.xlu1 %v351_v14, %s1450_s18  ;;  %372 = vrot.lane.b32.xlu0 %v349_v13, %s1450_s18 }
  0xda   : > { %v192_v19 = vpop.permute.xlu1 %191  ;;  %v201_v20 = vpop.permute.xlu0 %200 }
  0xdb   : > { %v194_v21 = vsel %vm193_vm0, %v190_v16, %v192_v19 }
  0xdc   : > { %196 = vst [vmem:[#allocation3 + $0x4] sm:$0xf] %v194_v21  ;;  %384 = vrot.lane.b32.xlu1 %v351_v14, %s1452_s23  ;;  %382 = vrot.lane.b32.xlu0 %v349_v13, %s1452_s23 }
  0xde   : > { %v203_v23 = vpop.permute.xlu1 %202  ;;  %v181_v24 = vpop.permute.xlu0 %180 }
  0xdf   : > { %v205_v25 = vsel %vm204_vm1, %v201_v20, %v203_v23  ;;  %v183_v26 = vsel %vm182_vm2, %v179_v17, %v181_v24  ;;  %v640_v24 = vld [vmem:[#allocation2 + $0x1c] sm:$0xf] }
  0xe0   : > { %207 = vst [vmem:[#allocation3 + $0x8] sm:$0xf] %v205_v25  ;;  %185 = vst [vmem:[#allocation3] sm:$0xf] %v183_v26  ;;  %396 = vrot.lane.b32.xlu1 %v1717_v22, %s1453_s7  ;;  %394 = vrot.lane.b32.xlu0 %v1710_v18, %s1453_s7 }
  0xe2   : > { %v214_v27 = vpop.permute.xlu1 %213  ;;  %v212_v28 = vpop.permute.xlu0 %211 }
  0xe3   : > { %v216_v29 = vsel %vm215_vm3, %v212_v28, %v214_v27 }
  0xe4   : > { %218 = vst [vmem:[#allocation3 + $0xc] sm:$0xf] %v216_v29  ;;  %635 = vrot.lane.b32.xlu1 %v351_v14, %s1452_s23  ;;  %633 = vrot.lane.b32.xlu0 %v349_v13, %s1452_s23  ;;  %v727_v14 = vcombine.high %v725_v10, %v725_v10 }
  0xe6   : > { %v227_v30 = vpop.permute.xlu1 %226  ;;  %v225_v31 = vpop.permute.xlu0 %224 }
  0xe7   : > { %v229_v32 = vsel %vm228_vm4, %v225_v31, %v227_v30  ;;  %v431_v36 = vld [vmem:[#allocation3] sm:$0xff] }
  0xe8   : > { %231 = vst [vmem:[#allocation3 + $0x14] sm:$0xf] %v229_v32  ;;  %647 = vrot.lane.b32.xlu1 %v1717_v22, %s1453_s7  ;;  %645 = vrot.lane.b32.xlu0 %v1710_v18, %s1453_s7 }
  0xea   : > { %v238_v33 = vpop.permute.xlu1 %237  ;;  %v236_v34 = vpop.permute.xlu0 %235 }
  0xeb   : > { %v240_v35 = vsel %vm239_vm5, %v236_v34, %v238_v33  ;;  %v432_v37 = vld [vmem:[#allocation3 + $0x8] sm:$0xff] }
  0xec   : > { %242 = vst [vmem:[#allocation3 + $0x18] sm:$0xf] %v240_v35  ;;  %657 = vrot.lane.b32.xlu1 %v1717_v22, %s1454_s29  ;;  %655 = vrot.lane.b32.xlu0 %v1710_v18, %s1454_s29  ;;  %v1092_v38 = vpack.c.bf16 %v432_v37, %v431_v36 }
  0xee   : > { %v249_v40 = vpop.permute.xlu1 %248  ;;  %1093 = vmatpush3.bf16.msra.mxu0 %v1092_v38  ;;  %v247_v41 = vpop.permute.xlu0 %246 }
  0xef   : > { %v251_v42 = vsel %vm250_vm6, %v247_v41, %v249_v40  ;;  %1094 = vmatprep.subr.bf16.mxu0 %v1451_v6  ;;  %v433_v43 = vld [vmem:[#allocation3 + $0x10] sm:$0xff] }
  0xf0   : > { %253 = vst [vmem:[#allocation3 + $0x1c] sm:$0xf] %v251_v42  ;;  %406 = vrot.lane.b32.xlu1 %v1717_v22, %s1454_s29  ;;  %404 = vrot.lane.b32.xlu0 %v1710_v18, %s1454_s29  ;;  %559 = vst [vmem:[#allocation3 + $0x10] sm:$0xf] %v558_v39 }
  0xf2   : > { %v260_v44 = vpop.permute.xlu1 %259  ;;  %v258_v45 = vpop.permute.xlu0 %257 }
  0xf3   : > { %v262_v46 = vsel %vm261_vm7, %v258_v45, %v260_v44 }
  0xf4   : > { %264 = vst [vmem:[#allocation3 + $0x20] sm:$0xf] %v262_v46  ;;  %416 = vrot.lane.b32.xlu1 %v1717_v22, %s1455_s21  ;;  %414 = vrot.lane.b32.xlu0 %v1710_v18, %s1455_s21 }
  0xf6   : > { %v272_v47 = vpop.permute.xlu1 %271  ;;  %v270_v48 = vpop.permute.xlu0 %269 }
  0xf7   : > { %v273_v49 = vsel %vm182_vm2, %v270_v48, %v272_v47  ;;  %v434_v50 = vld [vmem:[#allocation3 + $0x18] sm:$0xff] }
  0xf8   : > { %275 = vst [vmem:[#allocation3 + $0x24] sm:$0xf] %v273_v49  ;;  %426 = vrot.lane.b32.xlu1 %v1717_v22, %s1456_s30  ;;  %424 = vrot.lane.b32.xlu0 %v1710_v18, %s1456_s30  ;;  %v1095_v51 = vpack.c.bf16 %v434_v50, %v433_v43 }
  0xfa   : > { %v282_v52 = vpop.permute.xlu1 %281  ;;  %1096 = vmatpush3.bf16.msra.mxu0 %v1095_v51  ;;  %v280_v53 = vpop.permute.xlu0 %279 }
  0xfb   : > { %v283_v54 = vsel %vm193_vm0, %v280_v53, %v282_v52  ;;  %1097 = vmatprep.subr.bf16.mxu0 %v1451_v6 }
  0xfc   : > { %285 = vst [vmem:[#allocation3 + $0x28] sm:$0xf] %v283_v54  ;;  %667 = vrot.lane.b32.xlu1 %v1717_v22, %s1455_s21  ;;  %665 = vrot.lane.b32.xlu0 %v1710_v18, %s1455_s21 }
  0xfe   : > { %v292_v56 = vpop.permute.xlu1 %291  ;;  %v290_v57 = vpop.permute.xlu0 %289 }
  0xff   : > { %v293_v58 = vsel %vm204_vm1, %v290_v57, %v292_v56  ;;  %v435_v3 = vld [vmem:[#allocation3 + $0x20] sm:$0xff] }
 0x100   : > { %295 = vst [vmem:[#allocation3 + $0x2c] sm:$0xf] %v293_v58  ;;  %677 = vrot.lane.b32.xlu1 %v1717_v22, %s1456_s30  ;;  %675 = vrot.lane.b32.xlu0 %v1710_v18, %s1456_s30 }
 0x102   : > { %v524_v60 = vpop.permute.xlu1 %523  ;;  %v522_v61 = vpop.permute.xlu0 %521 }
 0x103   : > { %v525_v62 = vsel %vm182_vm2, %v522_v61, %v524_v60 }
 0x104   : > { %527 = vst [vmem:[#allocation3] sm:$0xf] %v525_v62  ;;  %688 = vrot.lane.b32.xlu1 %v685_v59, %s1449_s0  ;;  %686 = vrot.lane.b32.xlu0 %v683_v55, %s1449_s0  ;;  %s1932_s0 = sand.u32 1, %s1406_s10  }
 0x106   : > { %v534_v63 = vpop.permute.xlu1 %533  ;;  %v532_v1 = vpop.permute.xlu0 %531 }
 0x107   : > { %v535_v2 = vsel %vm193_vm0, %v532_v1, %v534_v63  ;;  %v436_v4 = vld [vmem:[#allocation3 + $0x28] sm:$0xff] }
 0x108   : > { %537 = vst [vmem:[#allocation3 + $0x4] sm:$0xf] %v535_v2  ;;  %698 = vrot.lane.b32.xlu1 %v685_v59, %s1448_s17  ;;  %696 = vrot.lane.b32.xlu0 %v683_v55, %s1448_s17  ;;  %v1098_v5 = vpack.c.bf16 %v436_v4, %v435_v3  ;;  %s1841_s17 = scalar_lea.hbm %s1911_s2, %s983_s26 }
 0x10a   : > { %v544_v7 = vpop.permute.xlu1 %543  ;;  %1099 = vmatpush3.bf16.msra.mxu0 %v1098_v5  ;;  %v542_v8 = vpop.permute.xlu0 %541 }
 0x10b   : > { %v545_v9 = vsel %vm204_vm1, %v542_v8, %v544_v7  ;;  %1100 = vmatprep.subr.bf16.mxu0 %v1451_v6 }
 0x10c   : > { %547 = vst [vmem:[#allocation3 + $0x8] sm:$0xf] %v545_v9  ;;  %708 = vrot.lane.b32.xlu1 %v685_v59, %s1450_s18  ;;  %706 = vrot.lane.b32.xlu0 %v683_v55, %s1450_s18  ;;  %s1848_s18 = scalar_lea.sflag [#allocation7], %s1932_s0 }
 0x10e   : > { %v554_v11 = vpop.permute.xlu1 %553  ;;  %v552_v12 = vpop.permute.xlu0 %551 }
 0x10f   : > { %v555_v13 = vsel %vm215_vm3, %v552_v12, %v554_v11  ;;  %v765_v21 = vld [vmem:[#allocation3] sm:$0xff] }
 0x110   : > { %557 = vst [vmem:[#allocation3 + $0xc] sm:$0xf] %v555_v13  ;;  %718 = vrot.lane.b32.xlu1 %v685_v59, %s1452_s23  ;;  %716 = vrot.lane.b32.xlu0 %v683_v55, %s1452_s23  ;;  %s1322_s23 = sshll.u32 %s1458_s16, 4  ;;  %s1323_s23 = int_to_ptr.vmem [resolvable:$false] %s1322_s23 }
 0x111   : > { %p1325_p2 = scmp.lt.s32.totalorder %s1843_s12, %s1323_s23 }
 0x112   : > { %v302_v15 = vpop.permute.xlu1 %301  ;;  %v300_v16 = vpop.permute.xlu0 %299 }
 0x113   : > { %v303_v17 = vsel %vm215_vm3, %v300_v16, %v302_v15 }
 0x114   : > { %305 = vst [vmem:[#allocation3 + $0x30] sm:$0xf] %v303_v17  ;;  %730 = vrot.lane.b32.xlu1 %v727_v14, %s1453_s7  ;;  %728 = vrot.lane.b32.xlu0 %v725_v10, %s1453_s7  ;;  %s1324_s7 = scalar_lea.vmem %s1323_s23, 512 }
 0x115   : > { %p1326_p4 = scmp.lt.s32.totalorder %s1324_s7, %s1318_s15 }
 0x116   : > { %v314_v18 = vpop.permute.xlu1 %313  ;;  %v312_v19 = vpop.permute.xlu0 %311 }
 0x117   : > { %v315_v20 = vsel %vm228_vm4, %v312_v19, %v314_v18  ;;  %v766_v22 = vld [vmem:[#allocation3 + $0x8] sm:$0xff]  ;;  %p1327_p11 = por %p1326_p4, %p1325_p2 }
 0x118   : > { %317 = vst [vmem:[#allocation3 + $0x38] sm:$0xf] %v315_v20  ;;  %740 = vrot.lane.b32.xlu1 %v727_v14, %s1454_s29  ;;  %738 = vrot.lane.b32.xlu0 %v725_v10, %s1454_s29  ;;  %v1116_v23 = vpack.c.bf16 %v766_v22, %v765_v21  ;;  %v723_v22 = vld [vmem:[#allocation2 + $0x28] sm:$0xf] }
 0x119   : > { %p1328_p1 = pnand %p1327_p11, %p1321_p12 }
 0x11a   : > { %v324_v25 = vpop.permute.xlu1 %323  ;;  %1117 = vmatpush3.bf16.msra.mxu1 %v1116_v23  ;;  %v322_v26 = vpop.permute.xlu0 %321 }
 0x11b   : > { %v325_v27 = vsel %vm239_vm5, %v322_v26, %v324_v25  ;;  %v437_v28 = vld [vmem:[#allocation3 + $0x30] sm:$0xff]  ;;  %1118 = vmatprep.subr.bf16.mxu1 %v1451_v6 }
 0x11c   : > { %327 = vst [vmem:[#allocation3 + $0x3c] sm:$0xf] %v325_v27  ;;  %750 = vrot.lane.b32.xlu1 %v727_v14, %s1455_s21  ;;  %748 = vrot.lane.b32.xlu0 %v725_v10, %s1455_s21  ;;  %641 = vst [vmem:[#allocation3 + $0x34] sm:$0xf] %v640_v24 }
 0x11e   : > { %v566_v29 = vpop.permute.xlu1 %565  ;;  %v564_v30 = vpop.permute.xlu0 %563 }
 0x11f   : > { %v567_v31 = vsel %vm228_vm4, %v564_v30, %v566_v29 }
 0x120   : > { %569 = vst [vmem:[#allocation3 + $0x14] sm:$0xf] %v567_v31  ;;  %760 = vrot.lane.b32.xlu1 %v727_v14, %s1456_s30  ;;  %758 = vrot.lane.b32.xlu0 %v725_v10, %s1456_s30 }
 0x122   : > { %v576_v32 = vpop.permute.xlu1 %575  ;;  %v574_v33 = vpop.permute.xlu0 %573 }
 0x123   : > { %v577_v34 = vsel %vm239_vm5, %v574_v33, %v576_v32  ;;  %v438_v35 = vld [vmem:[#allocation3 + $0x38] sm:$0xff] }
 0x124   : > { %579 = vst [vmem:[#allocation3 + $0x18] sm:$0xf] %v577_v34  ;;  %v1101_v36 = vpack.c.bf16 %v438_v35, %v437_v28 }
 0x126   : > { %v586_v37 = vpop.permute.xlu1 %585  ;;  %1102 = vmatpush3.bf16.msra.mxu0 %v1101_v36  ;;  %v584_v38 = vpop.permute.xlu0 %583 }
 0x127   : > { %v587_v39 = vsel %vm250_vm6, %v584_v38, %v586_v37  ;;  %1103 = vmatprep.subr.bf16.mxu0 %v1451_v6  ;;  %v767_v0 = vld [vmem:[#allocation3 + $0x10] sm:$0xff] }
 0x128   : > { %589 = vst [vmem:[#allocation3 + $0x1c] sm:$0xf] %v587_v39 }
 0x12a   : > { %v334_v40 = vpop.permute.xlu1 %333  ;;  %v332_v41 = vpop.permute.xlu0 %331 }
 0x12b   : > { %v335_v42 = vsel %vm250_vm6, %v332_v41, %v334_v40 }
 0x12c   : > { %337 = vst [vmem:[#allocation3 + $0x40] sm:$0xf] %v335_v42 }
 0x12e   : > { %v344_v43 = vpop.permute.xlu1 %343  ;;  %v342_v44 = vpop.permute.xlu0 %341 }
 0x12f   : > { %v345_v45 = vsel %vm261_vm7, %v342_v44, %v344_v43  ;;  %v768_v46 = vld [vmem:[#allocation3 + $0x18] sm:$0xff] }
 0x130   : > { %347 = vst [vmem:[#allocation3 + $0x44] sm:$0xf] %v345_v45  ;;  %v1119_v47 = vpack.c.bf16 %v768_v46, %v767_v0 }
 0x132   : > { %v355_v48 = vpop.permute.xlu1 %354  ;;  %1120 = vmatpush3.bf16.msra.mxu1 %v1119_v47  ;;  %v353_v49 = vpop.permute.xlu0 %352 }
 0x133   : > { %v356_v50 = vsel %vm182_vm2, %v353_v49, %v355_v48  ;;  %1121 = vmatprep.subr.bf16.mxu1 %v1451_v6  ;;  %v445_v48 = vld [vmem:[#allocation3 + $0x70] sm:$0xff] }
 0x134   : > { %358 = vst [vmem:[#allocation3 + $0x48] sm:$0xf] %v356_v50 }
 0x136   : > { %v365_v51 = vpop.permute.xlu1 %364  ;;  %v363_v52 = vpop.permute.xlu0 %362 }
 0x137   : > { %v366_v53 = vsel %vm193_vm0, %v363_v52, %v365_v51  ;;  %v439_v60 = vld [vmem:[#allocation3 + $0x40] sm:$0xff]  ;;  %v446_v52 = vld [vmem:[#allocation3 + $0x78] sm:$0xff] }
 0x138   : > { %368 = vst [vmem:[#allocation3 + $0x4c] sm:$0xf] %v366_v53 }
 0x13a   : > { %v596_v54 = vpop.permute.xlu1 %595  ;;  %v594_v55 = vpop.permute.xlu0 %593 }
 0x13b   : > { %v597_v56 = vsel %vm261_vm7, %v594_v55, %v596_v54 }
 0x13c   : > { %599 = vst [vmem:[#allocation3 + $0x20] sm:$0xf] %v597_v56  ;;  %v1113_v56 = vpack.c.bf16 %v446_v52, %v445_v48 }
 0x13e   : > { %v606_v57 = vpop.permute.xlu1 %605  ;;  %v604_v58 = vpop.permute.xlu0 %603 }
 0x13f   : > { %v607_v59 = vsel %vm182_vm2, %v604_v58, %v606_v57  ;;  %v440_v61 = vld [vmem:[#allocation3 + $0x48] sm:$0xff] }
 0x140   : > { %609 = vst [vmem:[#allocation3 + $0x24] sm:$0xf] %v607_v59  ;;  %v1104_v62 = vpack.c.bf16 %v440_v61, %v439_v60  ;;  %v174_v60 = vld [vmem:[%s1931_s28] sm:$0xff] }
 0x142   : > { %v616_v63 = vpop.permute.xlu1 %615  ;;  %1105 = vmatpush3.bf16.msra.mxu0 %v1104_v62  ;;  %v614_v1 = vpop.permute.xlu0 %613 }
 0x143   : > { %v617_v2 = vsel %vm193_vm0, %v614_v1, %v616_v63  ;;  %1106 = vmatprep.subr.bf16.mxu0 %v1451_v6 }
 0x144   : > { %619 = vst [vmem:[#allocation3 + $0x28] sm:$0xf] %v617_v2 }
 0x146   : > { %v626_v3 = vpop.permute.xlu1 %625  ;;  %v624_v4 = vpop.permute.xlu0 %623 }
 0x147   : > { %v627_v5 = vsel %vm204_vm1, %v624_v4, %v626_v3  ;;  %v769_v13 = vld [vmem:[#allocation3 + $0x20] sm:$0xff] }
 0x148   : > { %629 = vst [vmem:[#allocation3 + $0x2c] sm:$0xf] %v627_v5 }
 0x14a   : > { %v375_v7 = vpop.permute.xlu1 %374  ;;  %v373_v8 = vpop.permute.xlu0 %372 }
 0x14b   : > { %v376_v9 = vsel %vm204_vm1, %v373_v8, %v375_v7 }
 0x14c   : > { %378 = vst [vmem:[#allocation3 + $0x50] sm:$0xf] %v376_v9 }
 0x14e   : > { %v385_v10 = vpop.permute.xlu1 %384  ;;  %v383_v11 = vpop.permute.xlu0 %382 }
 0x14f   : > { %v386_v12 = vsel %vm215_vm3, %v383_v11, %v385_v10  ;;  %v770_v14 = vld [vmem:[#allocation3 + $0x28] sm:$0xff] }
 0x150   : > { %388 = vst [vmem:[#allocation3 + $0x54] sm:$0xf] %v386_v12  ;;  %v1122_v15 = vpack.c.bf16 %v770_v14, %v769_v13 }
 0x152   : > { %v397_v16 = vpop.permute.xlu1 %396  ;;  %1123 = vmatpush3.bf16.msra.mxu1 %v1122_v15  ;;  %v395_v17 = vpop.permute.xlu0 %394 }
 0x153   : > { %v398_v18 = vsel %vm228_vm4, %v395_v17, %v397_v16  ;;  %1124 = vmatprep.subr.bf16.mxu1 %v1451_v6 }
 0x154   : > { %400 = vst [vmem:[#allocation3 + $0x5c] sm:$0xf] %v398_v18 }
 0x156   : > { %v636_v19 = vpop.permute.xlu1 %635  ;;  %v634_v20 = vpop.permute.xlu0 %633 }
 0x157   : > { %v637_v21 = vsel %vm215_vm3, %v634_v20, %v636_v19  ;;  %v441_v26 = vld [vmem:[#allocation3 + $0x50] sm:$0xff] }
 0x158   : > { %639 = vst [vmem:[#allocation3 + $0x30] sm:$0xf] %v637_v21 }
 0x15a   : > { %v648_v23 = vpop.permute.xlu1 %647  ;;  %v646_v24 = vpop.permute.xlu0 %645 }
 0x15b   : > { %v649_v25 = vsel %vm228_vm4, %v646_v24, %v648_v23  ;;  %v442_v27 = vld [vmem:[#allocation3 + $0x58] sm:$0xff] }
 0x15c   : > { %651 = vst [vmem:[#allocation3 + $0x38] sm:$0xf] %v649_v25  ;;  %v1107_v28 = vpack.c.bf16 %v442_v27, %v441_v26  ;;  %724 = vst [vmem:[#allocation3 + $0x58] sm:$0xf] %v723_v22 }
 0x15e   : > { %v658_v29 = vpop.permute.xlu1 %657  ;;  %1108 = vmatpush3.bf16.msra.mxu0 %v1107_v28  ;;  %v656_v30 = vpop.permute.xlu0 %655 }
 0x15f   : > { %v659_v31 = vsel %vm239_vm5, %v656_v30, %v658_v29  ;;  %1109 = vmatprep.subr.bf16.mxu0 %v1451_v6  ;;  %v771_v38 = vld [vmem:[#allocation3 + $0x30] sm:$0xff] }
 0x160   : > { %661 = vst [vmem:[#allocation3 + $0x3c] sm:$0xf] %v659_v31 }
 0x162   : > { %v407_v32 = vpop.permute.xlu1 %406  ;;  %v405_v33 = vpop.permute.xlu0 %404 }
 0x163   : > { %v408_v34 = vsel %vm239_vm5, %v405_v33, %v407_v32 }
 0x164   : > { %410 = vst [vmem:[#allocation3 + $0x60] sm:$0xf] %v408_v34 }
 0x166   : > { %v417_v35 = vpop.permute.xlu1 %416  ;;  %v415_v36 = vpop.permute.xlu0 %414 }
 0x167   : > { %v418_v37 = vsel %vm250_vm6, %v415_v36, %v417_v35  ;;  %v772_v39 = vld [vmem:[#allocation3 + $0x38] sm:$0xff] }
 0x168   : > { %420 = vst [vmem:[#allocation3 + $0x64] sm:$0xf] %v418_v37  ;;  %v1125_v40 = vpack.c.bf16 %v772_v39, %v771_v38 }
 0x16a   : > { %v427_v41 = vpop.permute.xlu1 %426  ;;  %1126 = vmatpush3.bf16.msra.mxu1 %v1125_v40  ;;  %v425_v42 = vpop.permute.xlu0 %424 }
 0x16b   : > { %v428_v43 = vsel %vm261_vm7, %v425_v42, %v427_v41  ;;  %1127 = vmatprep.subr.bf16.mxu1 %v1451_v6 }
 0x16c   : > { %430 = vst [vmem:[#allocation3 + $0x68] sm:$0xf] %v428_v43 }
 0x16e   : > { %v668_v44 = vpop.permute.xlu1 %667  ;;  %v666_v45 = vpop.permute.xlu0 %665 }
 0x16f   : > { %v669_v0 = vsel %vm250_vm6, %v666_v45, %v668_v44  ;;  %v443_v50 = vld [vmem:[#allocation3 + $0x60] sm:$0xff] }
 0x170   : > { %671 = vst [vmem:[#allocation3 + $0x40] sm:$0xf] %v669_v0 }
 0x172   : > { %v678_v46 = vpop.permute.xlu1 %677  ;;  %v676_v47 = vpop.permute.xlu0 %675 }
 0x173   : > { %v679_v49 = vsel %vm261_vm7, %v676_v47, %v678_v46  ;;  %v444_v51 = vld [vmem:[#allocation3 + $0x68] sm:$0xff] }
 0x174   : > { %681 = vst [vmem:[#allocation3 + $0x44] sm:$0xf] %v679_v49  ;;  %v1110_v53 = vpack.c.bf16 %v444_v51, %v443_v50 }
 0x176   : > { %v689_v54 = vpop.permute.xlu1 %688  ;;  %1111 = vmatpush3.bf16.msra.mxu0 %v1110_v53  ;;  %v687_v55 = vpop.permute.xlu0 %686 }
 0x177   : > { %v690_v57 = vsel %vm182_vm2, %v687_v55, %v689_v54  ;;  %1112 = vmatprep.subr.bf16.mxu0 %v1451_v6 }
 0x178   : > { %692 = vst [vmem:[#allocation3 + $0x48] sm:$0xf] %v690_v57 }
 0x17a   : > { %v699_v58 = vpop.permute.xlu1 %698  ;;  %v697_v59 = vpop.permute.xlu0 %696  ;;  %1114 = vmatpush3.bf16.msra.mxu0 %v1113_v56 }
 0x17b   : > { %v700_v61 = vsel %vm193_vm0, %v697_v59, %v699_v58  ;;  %v773_v5 = vld [vmem:[#allocation3 + $0x40] sm:$0xff] }
 0x17c   : > { %702 = vst [vmem:[#allocation3 + $0x4c] sm:$0xf] %v700_v61 }
 0x17d   : > { %1054 = vmatmul.mubr.f32.vlgmr.msra.gmra.mrb[0].mxu0 %v174_v60 }
 0x17e   : > { %v709_v62 = vpop.permute.xlu1 %708  ;;  %v707_v63 = vpop.permute.xlu0 %706 }
 0x17f   : > { %v710_v1 = vsel %vm204_vm1, %v707_v63, %v709_v62 }
 0x180   : > { %712 = vst [vmem:[#allocation3 + $0x50] sm:$0xf] %v710_v1 }
 0x182   : > { %v719_v2 = vpop.permute.xlu1 %718  ;;  %v717_v3 = vpop.permute.xlu0 %716 }
 0x183   : > { %v720_v4 = vsel %vm215_vm3, %v717_v3, %v719_v2  ;;  %v774_v7 = vld [vmem:[#allocation3 + $0x48] sm:$0xff] }
 0x184   : > { %722 = vst [vmem:[#allocation3 + $0x54] sm:$0xf] %v720_v4  ;;  %v1128_v8 = vpack.c.bf16 %v774_v7, %v773_v5 }
 0x186   : > { %v731_v9 = vpop.permute.xlu1 %730  ;;  %1129 = vmatpush3.bf16.msra.mxu1 %v1128_v8  ;;  %v729_v10 = vpop.permute.xlu0 %728 }
 0x187   : > { %v732_v11 = vsel %vm228_vm4, %v729_v10, %v731_v9  ;;  %1130 = vmatprep.subr.bf16.mxu1 %v1451_v6 }
 0x188   : > { %734 = vst [vmem:[#allocation3 + $0x5c] sm:$0xf] %v732_v11 }
 0x18a   : > { %v741_v12 = vpop.permute.xlu1 %740  ;;  %v739_v13 = vpop.permute.xlu0 %738 }
 0x18b   : > { %v742_v14 = vsel %vm239_vm5, %v739_v13, %v741_v12  ;;  %v775_v18 = vld [vmem:[#allocation3 + $0x50] sm:$0xff] }
 0x18c   : > { %744 = vst [vmem:[#allocation3 + $0x60] sm:$0xf] %v742_v14 }
 0x18e   : > { %v751_v15 = vpop.permute.xlu1 %750  ;;  %v749_v16 = vpop.permute.xlu0 %748 }
 0x18f   : > { %v752_v17 = vsel %vm250_vm6, %v749_v16, %v751_v15  ;;  %v776_v19 = vld [vmem:[#allocation3 + $0x58] sm:$0xff] }
 0x190   : > { %754 = vst [vmem:[#allocation3 + $0x64] sm:$0xf] %v752_v17  ;;  %v1131_v20 = vpack.c.bf16 %v776_v19, %v775_v18 }
 0x192   : > { %v761_v21 = vpop.permute.xlu1 %760  ;;  %1132 = vmatpush3.bf16.msra.mxu1 %v1131_v20  ;;  %v759_v22 = vpop.permute.xlu0 %758 }
 0x193   : > { %v762_v23 = vsel %vm261_vm7, %v759_v22, %v761_v21  ;;  %1133 = vmatprep.subr.bf16.mxu1 %v1451_v6 }
 0x194   : > { %764 = vst [vmem:[#allocation3 + $0x68] sm:$0xf] %v762_v23 }
 0x197   : > { %v777_v24 = vld [vmem:[#allocation3 + $0x60] sm:$0xff] }
 0x19b   : > { %v778_v25 = vld [vmem:[#allocation3 + $0x68] sm:$0xff] }
 0x19c   : > { %v1134_v26 = vpack.c.bf16 %v778_v25, %v777_v24 }
 0x19e   : > { %1135 = vmatpush3.bf16.msra.mxu1 %v1134_v26 }
 0x19f   : > { %1136 = vmatprep.subr.bf16.mxu1 %v1451_v6 }
 0x1a2   : > { %1138 = vmatpush3.bf16.msra.mxu1 %v1113_v56 }
 0x1a5   : > { %1089 = vmatmul.mubr.f32.vlgmr.msra.gmra.mrb[0].mxu1 %v174_v60 }
 0x250   : > { %v513_v27 = vpop.f32.mrb[0].mxu0 }
 0x251   : > { %517 = vst [vmem:[%s1646_s22] sm:$0xff] %v513_v27  ;;  %v1055_v28 = vpop.f32.mrb[1].mxu0 }
 0x278   : > { %v847_v6 = vpop.f32.mrb[0].mxu1 }
 0x279   : > { %979 = vst [vmem:[%s1646_s22 + $0x8] sm:$0xff] %v847_v6  ;;  %v1090_v29 = vpop.f32.mrb[1].mxu1 }
 0x27a   : > { %1331 = shalt.err (!%p1328_p1)
}
 0x27b   : > { %s1332_s22 = scalar_lea.hbm %s1841_s17, 256  ;;  %s1336_s30 = scalar_lea.hbm %s1911_s2, 1024 }
 0x27c   : > { %p1333_p8 = scmp.ne.s32.totalorder %s1841_s17, %s1332_s22  ;;  %p1337_p13 = scmp.lt.u32.totalorder %s1841_s17, %s1911_s2 }
 0x27d   : > { %p1338_p0 = scmp.lt.u32.totalorder %s1336_s30, %s1332_s22  ;;  %p1340_p6 = scmp.lt.u32.totalorder %s1332_s22, %s1841_s17 }
 0x27e   : > { %p1334_p10 = pnand %p1333_p8, %p1933_p9 }
 0x27f   : > { %p1339_p5 = por %p1338_p0, %p1337_p13 }
 0x280   : > { %p1335_p3 = pneg %p1334_p10 }
 0x281   : > { %p1341_p7 = por %p1340_p6, %p1339_p5 }
 0x283   : > { %p1342_p12 = pnand %p1341_p7, %p1335_p3 }
 0x285   : > { %1345 = shalt.err (!%p1342_p12)
}
 0x286   : > { %s1459_s8 = smov 128   ;;  %s1460_s20 = smov 8  }
 0x287   : > { %1141 = dma.vmem_to_hbm [thread:$0]  (%p1933_p9), %s1843_s12, 256, %s1841_s17, %s1848_s18, %s1459_s8, %s1459_s8, %s1460_s20  }
 0x288 PF: > { %p1152_p2 = scmp.ge.s32.totalorder %s1442_s19, 2  ;;  %s884_s26 = sand.u32 1, %s1402_s9  }
 0x289   : > { %p1934_p4 = scmp.ne.s32.totalorder %s1926_s6, 0  ;;  %s885_s24 = scalar_lea.sflag [#allocation7], %s884_s26 }
 0x28b   : > { %p1148_p11 = pnand %p1152_p2, %p1934_p4 }
 0x28d   : > { %1397 = dma.done.wait (!%p1148_p11), %s885_s24, 256  }
 0x28e   : > { %1399 = vsyncadd (!%p1148_p11), %s885_s24, 4294967040  ;;  %s18_s19 = sadd.s32 1, %s1442_s19   ;;  %s1935_s15 = sld [smem:[#allocation16_spill]] }
 0x28f   : > { %p15_p1 = scmp.ge.s32.totalorder %s18_s19, 6   ;;  %s1936_s16 = sld [smem:[#allocation17_spill]] }
 0x290   : > { %s1937_s17 = sld [smem:[#allocation18_spill]]  ;;  %s1938_s18 = sld [smem:[#allocation19_spill]] }
 0x291   : > { %s1939_s9 = smov %s1406_s10  ;;  %s1940_s10 = smov %s1410_s11 }
 0x292   : > { %s1941_s11 = smov %s1566_s5  ;;  %s1942_s12 = smov %s1418_s13 }
 0x293   : > { %s1943_s13 = smov %s1422_s14  ;;  %s1944_s14 = smov %s1563_s4 }
 0x294   :  { %17 = sbr.rel (!%p15_p1) target bundleno = 11 (0xb), region = 78 }
 0x29b   :  { %890 = vsyncpa [#allocation6], 1 }
 0x29c   :  { %892 = vsyncpa [#allocation6 + $0x1], 1 }
 0x29d   :  { %893 = vsyncpa [#allocation7], 1 }
 0x29e   :  { %895 = vsyncpa [#allocation7 + $0x1], 1 }
 0x29f   :  { %896 = vsyncmov [#allocation4] }
 0x2a2   :  { %s897_s3 = vpop.sfrf %896 }
 0x2a3   :  { %p986_p9 = scmp.ne.s32.totalorder %s897_s3, 0 }
 0x2a5   :  { %901 = shalt.err (%p986_p9)  }

</bundles_post_ra>
